<compile_context>
chip_gen: v7x
topology: tpu7x:2x2x1
jax: 0.10.0
libtpu: 0.0.40
codegen_flags: <defaults>
</compile_context>

<pallas_src>
import numpy as np
import jax
import jax.numpy as jnp
from jax.experimental import pallas as pl
from jax.experimental.pallas import tpu as pltpu


# ----------------------------------------------------------------------------
# Pallas kernel
# ----------------------------------------------------------------------------
def bilstm_kernel(x_ref,                        # (T*Bp, 2D)  cols [x(t) | x(T-1-t)], bf16
                  wih0_ref, b0_ref,             # (2D, 8H) bf16 block-diag, (1, 8H) f32
                  whh0_ref,                     # (2H, 8H) bf16 block-diag
                  wih1f_ref, b1f_ref,           # (2H, 4H) bf16, (1, 4H) f32
                  whh1f_ref,                    # (H, 4H) bf16
                  wih1r_ref, b1r_ref,           # (2H, 4H) bf16, (1, 4H) f32
                  fcw_ref, fcb_ref,             # (2H, O) bf16, (1, O) f32
                  out_ref,                      # (Bp, O) f32
                  xp0_ref, seqf_ref, seqb_ref, xp1_ref):   # VMEM scratch
    Bp = out_ref.shape[0]
    H = whh1f_ref.shape[0]
    T = x_ref.shape[0] // Bp

    def gate_math(gates, c, hh):
        """LSTM cell element-wise math; gate cols are [i | f | o | g], each `hh`
        lanes wide (hh = 2H when both directions are packed). c=None means zero
        initial cell state (peeled first step -> f*c term dropped)."""
        sig = jax.nn.sigmoid(gates[:, 0:3 * hh])      # one EUP region: i, f, o
        i = sig[:, 0 * hh:1 * hh]
        f = sig[:, 1 * hh:2 * hh]
        o = sig[:, 2 * hh:3 * hh]
        g = jnp.tanh(gates[:, 3 * hh:4 * hh])         # one EUP region: g
        c_new = i * g if c is None else f * c + i * g
        h_new = o * jnp.tanh(c_new)
        return h_new, c_new

    # ---- layer-0 input projections: ONE matmul covering all T steps and BOTH
    # directions.  Because x_ref's second column-half is the time-reversed
    # input and wih0 is block-diagonal with gate-interleaved columns, row-block
    # t of xp0 already holds fwd gates for time t AND bwd gates for time T-1-t.
    xp0_ref[...] = (jnp.dot(x_ref[...], wih0_ref[...],
                            preferred_element_type=jnp.float32) + b0_ref[...])

    whh0 = whh0_ref[...]                               # (2H, 8H) bf16 block-diag

    # ---- layer 0: fwd(t) and bwd(T-1-t) fused into one chain over h_cat.
    # t = 0 peeled: zero state -> gates are just the input projection.
    h_cat, c_cat = gate_math(xp0_ref[0:Bp, :], None, 2 * H)
    seqf_ref[0:Bp, :] = h_cat[:, 0:H]
    seqb_ref[(T - 1) * Bp:T * Bp, :] = h_cat[:, H:2 * H]

    for t in range(1, T):
        tb = T - 1 - t
        gates = (xp0_ref[t * Bp:(t + 1) * Bp, :]
                 + jnp.dot(h_cat.astype(jnp.bfloat16), whh0,
                           preferred_element_type=jnp.float32))
        h_cat, c_cat = gate_math(gates, c_cat, 2 * H)
        seqf_ref[t * Bp:(t + 1) * Bp, :] = h_cat[:, 0:H]      # h_f(t)
        seqb_ref[tb * Bp:(tb + 1) * Bp, :] = h_cat[:, H:2 * H]  # h_b(T-1-t)

    # ---- layer-1 input projections (fwd direction, all T steps): split-weight
    # matmuls over the two separate sequence buffers (no lane concat).
    seqf = seqf_ref[...].astype(jnp.bfloat16)
    seqb = seqb_ref[...].astype(jnp.bfloat16)
    xp1_ref[...] = (jnp.dot(seqf, wih1f_ref[0:H, :],
                            preferred_element_type=jnp.float32)
                    + jnp.dot(seqb, wih1f_ref[H:2 * H, :],
                              preferred_element_type=jnp.float32)
                    + b1f_ref[...])

    # ---- layer-1 backward: out[:, -1, H:] is its FIRST step from a zero
    # state, so only the input projection at time T-1 is needed (no W_hh).
    g1r = (jnp.dot(seqf[(T - 1) * Bp:T * Bp, :], wih1r_ref[0:H, :],
                   preferred_element_type=jnp.float32)
           + jnp.dot(seqb[(T - 1) * Bp:T * Bp, :], wih1r_ref[H:2 * H, :],
                     preferred_element_type=jnp.float32)
           + b1r_ref[...])

    # ---- layer-1 fwd t=0 (peeled, zero state) fused with the independent
    # backward single step: one stacked gate_math over (2*Bp, 4H).
    g0 = jnp.concatenate([xp1_ref[0:Bp, :], g1r], axis=0)
    h0, c0 = gate_math(g0, None, H)
    h1f, c1f = h0[0:Bp, :], c0[0:Bp, :]
    h1r = h0[Bp:2 * Bp, :]

    whh1f = whh1f_ref[...]
    for t in range(1, T):
        gates = (xp1_ref[t * Bp:(t + 1) * Bp, :]
                 + jnp.dot(h1f.astype(jnp.bfloat16), whh1f,
                           preferred_element_type=jnp.float32))
        h1f, c1f = gate_math(gates, c1f, H)

    # ---- fc head on [h1f | h1r] via split weight halves (no lane concat).
    out_ref[...] = (jnp.dot(h1f.astype(jnp.bfloat16), fcw_ref[0:H, :],
                            preferred_element_type=jnp.float32)
                    + jnp.dot(h1r.astype(jnp.bfloat16), fcw_ref[H:2 * H, :],
                              preferred_element_type=jnp.float32)
                    + fcb_ref[...]).astype(out_ref.dtype)


# ----------------------------------------------------------------------------
# One-time weight packing (host-side numpy; NOT in the per-call path)
# ----------------------------------------------------------------------------
def pack_params(params):
    H = params["l0_f"]["w_hh"].shape[1]
    # torch gate order [i, f, g, o] -> kernel order [i, f, o, g]
    perm = np.concatenate([np.arange(0, 2 * H),
                           np.arange(3 * H, 4 * H),
                           np.arange(2 * H, 3 * H)])

    def prep(p):
        w_ih = np.asarray(p["w_ih"], np.float32)[perm].T        # (in, 4H)
        w_hh = np.asarray(p["w_hh"], np.float32)[perm].T        # (H, 4H)
        b = (np.asarray(p["b_ih"], np.float32)
             + np.asarray(p["b_hh"], np.float32))[perm][None]   # (1, 4H) fused bias
        return w_ih, w_hh, b

    def interleave_cols(af, ar):
        # -> gate-interleaved columns [i_f, i_b, f_f, f_b, o_f, o_b, g_f, g_b]
        blocks = []
        for g in range(4):
            blocks.append(af[:, g * H:(g + 1) * H])
            blocks.append(ar[:, g * H:(g + 1) * H])
        return np.concatenate(blocks, axis=1)

    def blockdiag(af, ar):
        ka, kb = af.shape[0], ar.shape[0]
        top = interleave_cols(af, np.zeros((ka, 4 * H), np.float32))
        bot = interleave_cols(np.zeros((kb, 4 * H), np.float32), ar)
        return np.concatenate([top, bot], axis=0)

    wih0f, whh0f, b0f = prep(params["l0_f"])
    wih0r, whh0r, b0r = prep(params["l0_r"])
    wih1f, whh1f, b1f = prep(params["l1_f"])
    wih1r, _whh1r, b1r = prep(params["l1_r"])   # layer-1 bwd W_hh unused (single zero-state step)

    bf16 = jnp.bfloat16
    return dict(
        wih0=jnp.asarray(blockdiag(wih0f, wih0r), bf16),          # (2D, 8H)
        b0=jnp.asarray(interleave_cols(b0f, b0r), jnp.float32),   # (1, 8H)
        whh0=jnp.asarray(blockdiag(whh0f, whh0r), bf16),          # (2H, 8H)
        wih1f=jnp.asarray(wih1f, bf16), b1f=jnp.asarray(b1f, jnp.float32),
        whh1f=jnp.asarray(whh1f, bf16),
        wih1r=jnp.asarray(wih1r, bf16), b1r=jnp.asarray(b1r, jnp.float32),
        fcw=jnp.asarray(np.asarray(params["fc_w"], np.float32).T, bf16),        # (2H, O)
        fcb=jnp.asarray(np.asarray(params["fc_b"], np.float32)[None], jnp.float32),  # (1, O)
    )


# ----------------------------------------------------------------------------
# Jitted forward wrapper
# ----------------------------------------------------------------------------
@jax.jit
def bilstm_forward(x, packed):
    """x: (B, T, D_in) batch-first (same convention as the PyTorch module)."""
    x = jnp.asarray(x, jnp.float32)
    B, T, D = x.shape
    H = packed["whh1f"].shape[0]
    O = packed["fcw"].shape[1]
    Bp = max(8, ((B + 7) // 8) * 8)       # pad batch to the 8-sublane tile

    xs = jnp.transpose(x, (1, 0, 2))                      # (T, B, D) time-major
    xs = jnp.pad(xs, ((0, 0), (0, Bp - B), (0, 0)))       # (T, Bp, D)
    x_pair = jnp.concatenate([xs, xs[::-1]], axis=-1)     # cols [x(t) | x(T-1-t)]
    x2d = x_pair.reshape(T * Bp, 2 * D).astype(jnp.bfloat16)

    out = pl.pallas_call(
        bilstm_kernel,
        out_shape=jax.ShapeDtypeStruct((Bp, O), jnp.float32),
        in_specs=[pl.BlockSpec(memory_space=pltpu.MemorySpace.VMEM)] * 11,
        out_specs=pl.BlockSpec(memory_space=pltpu.MemorySpace.VMEM),
        scratch_shapes=[
            pltpu.VMEM((T * Bp, 8 * H), jnp.float32),   # xp0: layer-0 projections (bwd half time-mirrored)
            pltpu.VMEM((T * Bp, H), jnp.float32),       # seqF: layer-0 fwd outputs
            pltpu.VMEM((T * Bp, H), jnp.float32),       # seqB: layer-0 bwd outputs
            pltpu.VMEM((T * Bp, 4 * H), jnp.float32),   # xp1: layer-1 fwd projections
        ],
    )(x2d, packed["wih0"], packed["b0"], packed["whh0"],
      packed["wih1f"], packed["b1f"], packed["whh1f"],
      packed["wih1r"], packed["b1r"], packed["fcw"], packed["fcb"])
    return out[:B]


# ----------------------------------------------------------------------------
# Pure-JAX reference (mirrors torch.nn.LSTM bidirectional, batch_first=True)
# Uses the ORIGINAL (unpermuted, f32) weights, validating all repacking.
# ----------------------------------------------------------------------------
def ref_bilstm(x, params):
    x = jnp.asarray(x, jnp.float32)
    B, T, _ = x.shape
    H = params["l0_f"]["w_hh"].shape[1]

    def cell(x_t, h, c, p):
        g = x_t @ p["w_ih"].T + p["b_ih"] + h @ p["w_hh"].T + p["b_hh"]
        i = jax.nn.sigmoid(g[:, 0 * H:1 * H])
        f = jax.nn.sigmoid(g[:, 1 * H:2 * H])
        gg = jnp.tanh(g[:, 2 * H:3 * H])
        o = jax.nn.sigmoid(g[:, 3 * H:4 * H])
        c = f * c + i * gg
        h = o * jnp.tanh(c)
        return h, c

    def run_dir(xs, p, reverse):
        h = jnp.zeros((B, H), jnp.float32)
        c = jnp.zeros((B, H), jnp.float32)
        outs = [None] * T
        order = range(T - 1, -1, -1) if reverse else range(T)
        for t in order:
            h, c = cell(xs[:, t], h, c, p)
            outs[t] = h
        return jnp.stack(outs, axis=1)

    o0 = jnp.concatenate([run_dir(x, params["l0_f"], False),
                          run_dir(x, params["l0_r"], True)], axis=-1)
    o1 = jnp.concatenate([run_dir(o0, params["l1_f"], False),
                          run_dir(o0, params["l1_r"], True)], axis=-1)
    last = o1[:, -1, :]
    return last @ params["fc_w"].T + params["fc_b"]


# ----------------------------------------------------------------------------
# Deterministic parameter init (PyTorch-style uniform(-1/sqrt(H), 1/sqrt(H)))
# ----------------------------------------------------------------------------
def init_params(key, input_size, hidden_size, output_size):
    H = hidden_size
    k = 1.0 / np.sqrt(H)

    def uni(key, shape):
        return jax.random.uniform(key, shape, jnp.float32, -k, k)

    params = {}
    keys = jax.random.split(key, 4 * 4 + 2)
    ki = 0
    layer_in = {"l0": input_size, "l1": 2 * H}
    for lname in ("l0", "l1"):
        for d in ("f", "r"):
            params[f"{lname}_{d}"] = {
                "w_ih": uni(keys[ki + 0], (4 * H, layer_in[lname])),
                "w_hh": uni(keys[ki + 1], (4 * H, H)),
                "b_ih": uni(keys[ki + 2], (4 * H,)),
                "b_hh": uni(keys[ki + 3], (4 * H,)),
            }
            ki += 4
    params["fc_w"] = uni(keys[ki + 0], (output_size, 2 * H))
    params["fc_b"] = uni(keys[ki + 1], (output_size,))
    return params


if __name__ == "__main__":
    B, T = 2, 8
    INPUT_SIZE, HIDDEN_SIZE, OUTPUT_SIZE = 2, 32, 2

    root = jax.random.PRNGKey(0)
    kx, kp = jax.random.split(root)
    x = jax.random.normal(kx, (B, T, INPUT_SIZE), jnp.float32)
    params = init_params(kp, INPUT_SIZE, HIDDEN_SIZE, OUTPUT_SIZE)

    packed = pack_params(params)              # one-time weight packing
    out = jax.block_until_ready(bilstm_forward(x, packed))
    ref = jax.block_until_ready(ref_bilstm(x, params))
    np.testing.assert_allclose(np.asarray(out), np.asarray(ref),
                               rtol=5e-2, atol=5e-2)

    print("KERNEL_OK")
</pallas_src>

<mosaic_0001>
module attributes {stable_mosaic.version = 11 : i64} {
  func.func @bilstm_kernel(%arg0: memref<64x4xbf16, #tpu.memory_space<vmem>>, %arg1: memref<4x256xbf16, #tpu.memory_space<vmem>>, %arg2: memref<1x256xf32, #tpu.memory_space<vmem>>, %arg3: memref<64x256xbf16, #tpu.memory_space<vmem>>, %arg4: memref<64x128xbf16, #tpu.memory_space<vmem>>, %arg5: memref<1x128xf32, #tpu.memory_space<vmem>>, %arg6: memref<32x128xbf16, #tpu.memory_space<vmem>>, %arg7: memref<64x128xbf16, #tpu.memory_space<vmem>>, %arg8: memref<1x128xf32, #tpu.memory_space<vmem>>, %arg9: memref<64x2xbf16, #tpu.memory_space<vmem>>, %arg10: memref<1x2xf32, #tpu.memory_space<vmem>>, %arg11: memref<8x2xf32, #tpu.memory_space<vmem>>, %arg12: memref<64x256xf32, #tpu.memory_space<vmem>>, %arg13: memref<64x32xf32, #tpu.memory_space<vmem>>, %arg14: memref<64x32xf32, #tpu.memory_space<vmem>>, %arg15: memref<64x128xf32, #tpu.memory_space<vmem>>) attributes {dimension_semantics = [], scalar_prefetch = 0 : i64, scratch_operands = 4 : i64, tpu.core_type = #tpu.core_type<tc>} {
    %c0 = arith.constant 0 : index
    %c0_0 = arith.constant 0 : index
    %0 = vector.load %arg0[%c0, %c0_0] : memref<64x4xbf16, #tpu.memory_space<vmem>>, vector<64x4xbf16>
    %c0_1 = arith.constant 0 : index
    %c0_2 = arith.constant 0 : index
    %1 = vector.load %arg1[%c0_1, %c0_2] : memref<4x256xbf16, #tpu.memory_space<vmem>>, vector<4x256xbf16>
    %cst = arith.constant dense<0.000000e+00> : vector<64x256xf32>
    %2 = tpu.matmul %0, %1, %cst {dimension_numbers = #tpu.dot_dimension_numbers<[1], [0], [0], [1], [0, 0, 1, 1], [], []>} : vector<64x4xbf16>, vector<4x256xbf16>, vector<64x256xf32> -> vector<64x256xf32>
    %c0_3 = arith.constant 0 : index
    %c0_4 = arith.constant 0 : index
    %3 = vector.load %arg2[%c0_3, %c0_4] : memref<1x256xf32, #tpu.memory_space<vmem>>, vector<1x256xf32>
    %4 = vector.broadcast %3 : vector<1x256xf32> to vector<64x256xf32>
    %5 = arith.addf %2, %4 : vector<64x256xf32>
    %c0_5 = arith.constant 0 : index
    %c0_6 = arith.constant 0 : index
    %6 = vector.load %arg12[%c0_5, %c0_6] : memref<64x256xf32, #tpu.memory_space<vmem>>, vector<64x256xf32>
    tpu.vector_store %arg12[%c0_5, %c0_6], %5 {strides = array<i32>} : memref<64x256xf32, #tpu.memory_space<vmem>>, vector<64x256xf32>,
    %c0_7 = arith.constant 0 : index
    %c0_8 = arith.constant 0 : index
    %7 = vector.load %arg3[%c0_7, %c0_8] : memref<64x256xbf16, #tpu.memory_space<vmem>>, vector<64x256xbf16>
    %c0_9 = arith.constant 0 : index
    %c0_10 = arith.constant 0 : index
    %8 = vector.load %arg12[%c0_9, %c0_10] : memref<64x256xf32, #tpu.memory_space<vmem>>, vector<8x256xf32>
    %9 = vector.extract_strided_slice %8 {offsets = [0, 0], sizes = [8, 192], strides = [1, 1]} : vector<8x256xf32> to vector<8x192xf32>
    %10 = arith.negf %9 : vector<8x192xf32>
    %11 = math.exp %10 : vector<8x192xf32>
    %cst_11 = arith.constant 1.000000e+00 : f32
    %12 = vector.broadcast %cst_11 : f32 to vector<8x192xf32>
    %13 = arith.addf %12, %11 : vector<8x192xf32>
    %14 = arith.divf %12, %13 : vector<8x192xf32>
    %15 = vector.extract_strided_slice %14 {offsets = [0, 0], sizes = [8, 64], strides = [1, 1]} : vector<8x192xf32> to vector<8x64xf32>
    %16 = vector.extract_strided_slice %14 {offsets = [0, 128], sizes = [8, 64], strides = [1, 1]} : vector<8x192xf32> to vector<8x64xf32>
    %17 = vector.extract_strided_slice %8 {offsets = [0, 192], sizes = [8, 64], strides = [1, 1]} : vector<8x256xf32> to vector<8x64xf32>
    %18 = math.tanh %17 : vector<8x64xf32>
    %19 = arith.mulf %15, %18 : vector<8x64xf32>
    %20 = math.tanh %19 : vector<8x64xf32>
    %21 = arith.mulf %16, %20 : vector<8x64xf32>
    %22 = vector.extract_strided_slice %21 {offsets = [0, 0], sizes = [8, 32], strides = [1, 1]} : vector<8x64xf32> to vector<8x32xf32>
    %c0_12 = arith.constant 0 : index
    %c0_13 = arith.constant 0 : index
    %23 = vector.load %arg13[%c0_12, %c0_13] : memref<64x32xf32, #tpu.memory_space<vmem>>, vector<8x32xf32>
    tpu.vector_store %arg13[%c0_12, %c0_13], %22 {strides = array<i32>} : memref<64x32xf32, #tpu.memory_space<vmem>>, vector<8x32xf32>,
    %24 = vector.extract_strided_slice %21 {offsets = [0, 32], sizes = [8, 32], strides = [1, 1]} : vector<8x64xf32> to vector<8x32xf32>
    %c56 = arith.constant 56 : index
    %c0_14 = arith.constant 0 : index
    %25 = vector.load %arg14[%c56, %c0_14] : memref<64x32xf32, #tpu.memory_space<vmem>>, vector<8x32xf32>
    tpu.vector_store %arg14[%c56, %c0_14], %24 {strides = array<i32>} : memref<64x32xf32, #tpu.memory_space<vmem>>, vector<8x32xf32>,
    %c8 = arith.constant 8 : index
    %c0_15 = arith.constant 0 : index
    %26 = vector.load %arg12[%c8, %c0_15] : memref<64x256xf32, #tpu.memory_space<vmem>>, vector<8x256xf32>
    %27 = arith.truncf %21 : vector<8x64xf32> to vector<8x64xbf16>
    %cst_16 = arith.constant dense<0.000000e+00> : vector<8x256xf32>
    %28 = tpu.matmul %27, %7, %cst_16 {dimension_numbers = #tpu.dot_dimension_numbers<[1], [0], [0], [1], [0, 0, 1, 1], [], []>} : vector<8x64xbf16>, vector<64x256xbf16>, vector<8x256xf32> -> vector<8x256xf32>
    %29 = arith.addf %26, %28 : vector<8x256xf32>
    %30 = vector.extract_strided_slice %29 {offsets = [0, 0], sizes = [8, 192], strides = [1, 1]} : vector<8x256xf32> to vector<8x192xf32>
    %31 = arith.negf %30 : vector<8x192xf32>
    %32 = math.exp %31 : vector<8x192xf32>
    %cst_17 = arith.constant 1.000000e+00 : f32
    %33 = vector.broadcast %cst_17 : f32 to vector<8x192xf32>
    %34 = arith.addf %33, %32 : vector<8x192xf32>
    %35 = arith.divf %33, %34 : vector<8x192xf32>
    %36 = vector.extract_strided_slice %35 {offsets = [0, 0], sizes = [8, 64], strides = [1, 1]} : vector<8x192xf32> to vector<8x64xf32>
    %37 = vector.extract_strided_slice %35 {offsets = [0, 64], sizes = [8, 64], strides = [1, 1]} : vector<8x192xf32> to vector<8x64xf32>
    %38 = vector.extract_strided_slice %35 {offsets = [0, 128], sizes = [8, 64], strides = [1, 1]} : vector<8x192xf32> to vector<8x64xf32>
    %39 = vector.extract_strided_slice %29 {offsets = [0, 192], sizes = [8, 64], strides = [1, 1]} : vector<8x256xf32> to vector<8x64xf32>
    %40 = math.tanh %39 : vector<8x64xf32>
    %41 = arith.mulf %37, %19 : vector<8x64xf32>
    %42 = arith.mulf %36, %40 : vector<8x64xf32>
    %43 = arith.addf %41, %42 : vector<8x64xf32>
    %44 = math.tanh %43 : vector<8x64xf32>
    %45 = arith.mulf %38, %44 : vector<8x64xf32>
    %46 = vector.extract_strided_slice %45 {offsets = [0, 0], sizes = [8, 32], strides = [1, 1]} : vector<8x64xf32> to vector<8x32xf32>
    %c8_18 = arith.constant 8 : index
    %c0_19 = arith.constant 0 : index
    %47 = vector.load %arg13[%c8_18, %c0_19] : memref<64x32xf32, #tpu.memory_space<vmem>>, vector<8x32xf32>
    tpu.vector_store %arg13[%c8_18, %c0_19], %46 {strides = array<i32>} : memref<64x32xf32, #tpu.memory_space<vmem>>, vector<8x32xf32>,
    %48 = vector.extract_strided_slice %45 {offsets = [0, 32], sizes = [8, 32], strides = [1, 1]} : vector<8x64xf32> to vector<8x32xf32>
    %c48 = arith.constant 48 : index
    %c0_20 = arith.constant 0 : index
    %49 = vector.load %arg14[%c48, %c0_20] : memref<64x32xf32, #tpu.memory_space<vmem>>, vector<8x32xf32>
    tpu.vector_store %arg14[%c48, %c0_20], %48 {strides = array<i32>} : memref<64x32xf32, #tpu.memory_space<vmem>>, vector<8x32xf32>,
    %c16 = arith.constant 16 : index
    %c0_21 = arith.constant 0 : index
    %50 = vector.load %arg12[%c16, %c0_21] : memref<64x256xf32, #tpu.memory_space<vmem>>, vector<8x256xf32>
    %51 = arith.truncf %45 : vector<8x64xf32> to vector<8x64xbf16>
    %cst_22 = arith.constant dense<0.000000e+00> : vector<8x256xf32>
    %52 = tpu.matmul %51, %7, %cst_22 {dimension_numbers = #tpu.dot_dimension_numbers<[1], [0], [0], [1], [0, 0, 1, 1], [], []>} : vector<8x64xbf16>, vector<64x256xbf16>, vector<8x256xf32> -> vector<8x256xf32>
    %53 = arith.addf %50, %52 : vector<8x256xf32>
    %54 = vector.extract_strided_slice %53 {offsets = [0, 0], sizes = [8, 192], strides = [1, 1]} : vector<8x256xf32> to vector<8x192xf32>
    %55 = arith.negf %54 : vector<8x192xf32>
    %56 = math.exp %55 : vector<8x192xf32>
    %cst_23 = arith.constant 1.000000e+00 : f32
    %57 = vector.broadcast %cst_23 : f32 to vector<8x192xf32>
    %58 = arith.addf %57, %56 : vector<8x192xf32>
    %59 = arith.divf %57, %58 : vector<8x192xf32>
    %60 = vector.extract_strided_slice %59 {offsets = [0, 0], sizes = [8, 64], strides = [1, 1]} : vector<8x192xf32> to vector<8x64xf32>
    %61 = vector.extract_strided_slice %59 {offsets = [0, 64], sizes = [8, 64], strides = [1, 1]} : vector<8x192xf32> to vector<8x64xf32>
    %62 = vector.extract_strided_slice %59 {offsets = [0, 128], sizes = [8, 64], strides = [1, 1]} : vector<8x192xf32> to vector<8x64xf32>
    %63 = vector.extract_strided_slice %53 {offsets = [0, 192], sizes = [8, 64], strides = [1, 1]} : vector<8x256xf32> to vector<8x64xf32>
    %64 = math.tanh %63 : vector<8x64xf32>
    %65 = arith.mulf %61, %43 : vector<8x64xf32>
    %66 = arith.mulf %60, %64 : vector<8x64xf32>
    %67 = arith.addf %65, %66 : vector<8x64xf32>
    %68 = math.tanh %67 : vector<8x64xf32>
    %69 = arith.mulf %62, %68 : vector<8x64xf32>
    %70 = vector.extract_strided_slice %69 {offsets = [0, 0], sizes = [8, 32], strides = [1, 1]} : vector<8x64xf32> to vector<8x32xf32>
    %c16_24 = arith.constant 16 : index
    %c0_25 = arith.constant 0 : index
    %71 = vector.load %arg13[%c16_24, %c0_25] : memref<64x32xf32, #tpu.memory_space<vmem>>, vector<8x32xf32>
    tpu.vector_store %arg13[%c16_24, %c0_25], %70 {strides = array<i32>} : memref<64x32xf32, #tpu.memory_space<vmem>>, vector<8x32xf32>,
    %72 = vector.extract_strided_slice %69 {offsets = [0, 32], sizes = [8, 32], strides = [1, 1]} : vector<8x64xf32> to vector<8x32xf32>
    %c40 = arith.constant 40 : index
    %c0_26 = arith.constant 0 : index
    %73 = vector.load %arg14[%c40, %c0_26] : memref<64x32xf32, #tpu.memory_space<vmem>>, vector<8x32xf32>
    tpu.vector_store %arg14[%c40, %c0_26], %72 {strides = array<i32>} : memref<64x32xf32, #tpu.memory_space<vmem>>, vector<8x32xf32>,
    %c24 = arith.constant 24 : index
    %c0_27 = arith.constant 0 : index
    %74 = vector.load %arg12[%c24, %c0_27] : memref<64x256xf32, #tpu.memory_space<vmem>>, vector<8x256xf32>
    %75 = arith.truncf %69 : vector<8x64xf32> to vector<8x64xbf16>
    %cst_28 = arith.constant dense<0.000000e+00> : vector<8x256xf32>
    %76 = tpu.matmul %75, %7, %cst_28 {dimension_numbers = #tpu.dot_dimension_numbers<[1], [0], [0], [1], [0, 0, 1, 1], [], []>} : vector<8x64xbf16>, vector<64x256xbf16>, vector<8x256xf32> -> vector<8x256xf32>
    %77 = arith.addf %74, %76 : vector<8x256xf32>
    %78 = vector.extract_strided_slice %77 {offsets = [0, 0], sizes = [8, 192], strides = [1, 1]} : vector<8x256xf32> to vector<8x192xf32>
    %79 = arith.negf %78 : vector<8x192xf32>
    %80 = math.exp %79 : vector<8x192xf32>
    %cst_29 = arith.constant 1.000000e+00 : f32
    %81 = vector.broadcast %cst_29 : f32 to vector<8x192xf32>
    %82 = arith.addf %81, %80 : vector<8x192xf32>
    %83 = arith.divf %81, %82 : vector<8x192xf32>
    %84 = vector.extract_strided_slice %83 {offsets = [0, 0], sizes = [8, 64], strides = [1, 1]} : vector<8x192xf32> to vector<8x64xf32>
    %85 = vector.extract_strided_slice %83 {offsets = [0, 64], sizes = [8, 64], strides = [1, 1]} : vector<8x192xf32> to vector<8x64xf32>
    %86 = vector.extract_strided_slice %83 {offsets = [0, 128], sizes = [8, 64], strides = [1, 1]} : vector<8x192xf32> to vector<8x64xf32>
    %87 = vector.extract_strided_slice %77 {offsets = [0, 192], sizes = [8, 64], strides = [1, 1]} : vector<8x256xf32> to vector<8x64xf32>
    %88 = math.tanh %87 : vector<8x64xf32>
    %89 = arith.mulf %85, %67 : vector<8x64xf32>
    %90 = arith.mulf %84, %88 : vector<8x64xf32>
    %91 = arith.addf %89, %90 : vector<8x64xf32>
    %92 = math.tanh %91 : vector<8x64xf32>
    %93 = arith.mulf %86, %92 : vector<8x64xf32>
    %94 = vector.extract_strided_slice %93 {offsets = [0, 0], sizes = [8, 32], strides = [1, 1]} : vector<8x64xf32> to vector<8x32xf32>
    %c24_30 = arith.constant 24 : index
    %c0_31 = arith.constant 0 : index
    %95 = vector.load %arg13[%c24_30, %c0_31] : memref<64x32xf32, #tpu.memory_space<vmem>>, vector<8x32xf32>
    tpu.vector_store %arg13[%c24_30, %c0_31], %94 {strides = array<i32>} : memref<64x32xf32, #tpu.memory_space<vmem>>, vector<8x32xf32>,
    %96 = vector.extract_strided_slice %93 {offsets = [0, 32], sizes = [8, 32], strides = [1, 1]} : vector<8x64xf32> to vector<8x32xf32>
    %c32 = arith.constant 32 : index
    %c0_32 = arith.constant 0 : index
    %97 = vector.load %arg14[%c32, %c0_32] : memref<64x32xf32, #tpu.memory_space<vmem>>, vector<8x32xf32>
    tpu.vector_store %arg14[%c32, %c0_32], %96 {strides = array<i32>} : memref<64x32xf32, #tpu.memory_space<vmem>>, vector<8x32xf32>,
    %c32_33 = arith.constant 32 : index
    %c0_34 = arith.constant 0 : index
    %98 = vector.load %arg12[%c32_33, %c0_34] : memref<64x256xf32, #tpu.memory_space<vmem>>, vector<8x256xf32>
    %99 = arith.truncf %93 : vector<8x64xf32> to vector<8x64xbf16>
    %cst_35 = arith.constant dense<0.000000e+00> : vector<8x256xf32>
    %100 = tpu.matmul %99, %7, %cst_35 {dimension_numbers = #tpu.dot_dimension_numbers<[1], [0], [0], [1], [0, 0, 1, 1], [], []>} : vector<8x64xbf16>, vector<64x256xbf16>, vector<8x256xf32> -> vector<8x256xf32>
    %101 = arith.addf %98, %100 : vector<8x256xf32>
    %102 = vector.extract_strided_slice %101 {offsets = [0, 0], sizes = [8, 192], strides = [1, 1]} : vector<8x256xf32> to vector<8x192xf32>
    %103 = arith.negf %102 : vector<8x192xf32>
    %104 = math.exp %103 : vector<8x192xf32>
    %cst_36 = arith.constant 1.000000e+00 : f32
    %105 = vector.broadcast %cst_36 : f32 to vector<8x192xf32>
    %106 = arith.addf %105, %104 : vector<8x192xf32>
    %107 = arith.divf %105, %106 : vector<8x192xf32>
    %108 = vector.extract_strided_slice %107 {offsets = [0, 0], sizes = [8, 64], strides = [1, 1]} : vector<8x192xf32> to vector<8x64xf32>
    %109 = vector.extract_strided_slice %107 {offsets = [0, 64], sizes = [8, 64], strides = [1, 1]} : vector<8x192xf32> to vector<8x64xf32>
    %110 = vector.extract_strided_slice %107 {offsets = [0, 128], sizes = [8, 64], strides = [1, 1]} : vector<8x192xf32> to vector<8x64xf32>
    %111 = vector.extract_strided_slice %101 {offsets = [0, 192], sizes = [8, 64], strides = [1, 1]} : vector<8x256xf32> to vector<8x64xf32>
    %112 = math.tanh %111 : vector<8x64xf32>
    %113 = arith.mulf %109, %91 : vector<8x64xf32>
    %114 = arith.mulf %108, %112 : vector<8x64xf32>
    %115 = arith.addf %113, %114 : vector<8x64xf32>
    %116 = math.tanh %115 : vector<8x64xf32>
    %117 = arith.mulf %110, %116 : vector<8x64xf32>
    %118 = vector.extract_strided_slice %117 {offsets = [0, 0], sizes = [8, 32], strides = [1, 1]} : vector<8x64xf32> to vector<8x32xf32>
    %c32_37 = arith.constant 32 : index
    %c0_38 = arith.constant 0 : index
    %119 = vector.load %arg13[%c32_37, %c0_38] : memref<64x32xf32, #tpu.memory_space<vmem>>, vector<8x32xf32>
    tpu.vector_store %arg13[%c32_37, %c0_38], %118 {strides = array<i32>} : memref<64x32xf32, #tpu.memory_space<vmem>>, vector<8x32xf32>,
    %120 = vector.extract_strided_slice %117 {offsets = [0, 32], sizes = [8, 32], strides = [1, 1]} : vector<8x64xf32> to vector<8x32xf32>
    %c24_39 = arith.constant 24 : index
    %c0_40 = arith.constant 0 : index
    %121 = vector.load %arg14[%c24_39, %c0_40] : memref<64x32xf32, #tpu.memory_space<vmem>>, vector<8x32xf32>
    tpu.vector_store %arg14[%c24_39, %c0_40], %120 {strides = array<i32>} : memref<64x32xf32, #tpu.memory_space<vmem>>, vector<8x32xf32>,
    %c40_41 = arith.constant 40 : index
    %c0_42 = arith.constant 0 : index
    %122 = vector.load %arg12[%c40_41, %c0_42] : memref<64x256xf32, #tpu.memory_space<vmem>>, vector<8x256xf32>
    %123 = arith.truncf %117 : vector<8x64xf32> to vector<8x64xbf16>
    %cst_43 = arith.constant dense<0.000000e+00> : vector<8x256xf32>
    %124 = tpu.matmul %123, %7, %cst_43 {dimension_numbers = #tpu.dot_dimension_numbers<[1], [0], [0], [1], [0, 0, 1, 1], [], []>} : vector<8x64xbf16>, vector<64x256xbf16>, vector<8x256xf32> -> vector<8x256xf32>
    %125 = arith.addf %122, %124 : vector<8x256xf32>
    %126 = vector.extract_strided_slice %125 {offsets = [0, 0], sizes = [8, 192], strides = [1, 1]} : vector<8x256xf32> to vector<8x192xf32>
    %127 = arith.negf %126 : vector<8x192xf32>
    %128 = math.exp %127 : vector<8x192xf32>
    %cst_44 = arith.constant 1.000000e+00 : f32
    %129 = vector.broadcast %cst_44 : f32 to vector<8x192xf32>
    %130 = arith.addf %129, %128 : vector<8x192xf32>
    %131 = arith.divf %129, %130 : vector<8x192xf32>
    %132 = vector.extract_strided_slice %131 {offsets = [0, 0], sizes = [8, 64], strides = [1, 1]} : vector<8x192xf32> to vector<8x64xf32>
    %133 = vector.extract_strided_slice %131 {offsets = [0, 64], sizes = [8, 64], strides = [1, 1]} : vector<8x192xf32> to vector<8x64xf32>
    %134 = vector.extract_strided_slice %131 {offsets = [0, 128], sizes = [8, 64], strides = [1, 1]} : vector<8x192xf32> to vector<8x64xf32>
    %135 = vector.extract_strided_slice %125 {offsets = [0, 192], sizes = [8, 64], strides = [1, 1]} : vector<8x256xf32> to vector<8x64xf32>
    %136 = math.tanh %135 : vector<8x64xf32>
    %137 = arith.mulf %133, %115 : vector<8x64xf32>
    %138 = arith.mulf %132, %136 : vector<8x64xf32>
    %139 = arith.addf %137, %138 : vector<8x64xf32>
    %140 = math.tanh %139 : vector<8x64xf32>
    %141 = arith.mulf %134, %140 : vector<8x64xf32>
    %142 = vector.extract_strided_slice %141 {offsets = [0, 0], sizes = [8, 32], strides = [1, 1]} : vector<8x64xf32> to vector<8x32xf32>
    %c40_45 = arith.constant 40 : index
    %c0_46 = arith.constant 0 : index
    %143 = vector.load %arg13[%c40_45, %c0_46] : memref<64x32xf32, #tpu.memory_space<vmem>>, vector<8x32xf32>
    tpu.vector_store %arg13[%c40_45, %c0_46], %142 {strides = array<i32>} : memref<64x32xf32, #tpu.memory_space<vmem>>, vector<8x32xf32>,
    %144 = vector.extract_strided_slice %141 {offsets = [0, 32], sizes = [8, 32], strides = [1, 1]} : vector<8x64xf32> to vector<8x32xf32>
    %c16_47 = arith.constant 16 : index
    %c0_48 = arith.constant 0 : index
    %145 = vector.load %arg14[%c16_47, %c0_48] : memref<64x32xf32, #tpu.memory_space<vmem>>, vector<8x32xf32>
    tpu.vector_store %arg14[%c16_47, %c0_48], %144 {strides = array<i32>} : memref<64x32xf32, #tpu.memory_space<vmem>>, vector<8x32xf32>,
    %c48_49 = arith.constant 48 : index
    %c0_50 = arith.constant 0 : index
    %146 = vector.load %arg12[%c48_49, %c0_50] : memref<64x256xf32, #tpu.memory_space<vmem>>, vector<8x256xf32>
    %147 = arith.truncf %141 : vector<8x64xf32> to vector<8x64xbf16>
    %cst_51 = arith.constant dense<0.000000e+00> : vector<8x256xf32>
    %148 = tpu.matmul %147, %7, %cst_51 {dimension_numbers = #tpu.dot_dimension_numbers<[1], [0], [0], [1], [0, 0, 1, 1], [], []>} : vector<8x64xbf16>, vector<64x256xbf16>, vector<8x256xf32> -> vector<8x256xf32>
    %149 = arith.addf %146, %148 : vector<8x256xf32>
    %150 = vector.extract_strided_slice %149 {offsets = [0, 0], sizes = [8, 192], strides = [1, 1]} : vector<8x256xf32> to vector<8x192xf32>
    %151 = arith.negf %150 : vector<8x192xf32>
    %152 = math.exp %151 : vector<8x192xf32>
    %cst_52 = arith.constant 1.000000e+00 : f32
    %153 = vector.broadcast %cst_52 : f32 to vector<8x192xf32>
    %154 = arith.addf %153, %152 : vector<8x192xf32>
    %155 = arith.divf %153, %154 : vector<8x192xf32>
    %156 = vector.extract_strided_slice %155 {offsets = [0, 0], sizes = [8, 64], strides = [1, 1]} : vector<8x192xf32> to vector<8x64xf32>
    %157 = vector.extract_strided_slice %155 {offsets = [0, 64], sizes = [8, 64], strides = [1, 1]} : vector<8x192xf32> to vector<8x64xf32>
    %158 = vector.extract_strided_slice %155 {offsets = [0, 128], sizes = [8, 64], strides = [1, 1]} : vector<8x192xf32> to vector<8x64xf32>
    %159 = vector.extract_strided_slice %149 {offsets = [0, 192], sizes = [8, 64], strides = [1, 1]} : vector<8x256xf32> to vector<8x64xf32>
    %160 = math.tanh %159 : vector<8x64xf32>
    %161 = arith.mulf %157, %139 : vector<8x64xf32>
    %162 = arith.mulf %156, %160 : vector<8x64xf32>
    %163 = arith.addf %161, %162 : vector<8x64xf32>
    %164 = math.tanh %163 : vector<8x64xf32>
    %165 = arith.mulf %158, %164 : vector<8x64xf32>
    %166 = vector.extract_strided_slice %165 {offsets = [0, 0], sizes = [8, 32], strides = [1, 1]} : vector<8x64xf32> to vector<8x32xf32>
    %c48_53 = arith.constant 48 : index
    %c0_54 = arith.constant 0 : index
    %167 = vector.load %arg13[%c48_53, %c0_54] : memref<64x32xf32, #tpu.memory_space<vmem>>, vector<8x32xf32>
    tpu.vector_store %arg13[%c48_53, %c0_54], %166 {strides = array<i32>} : memref<64x32xf32, #tpu.memory_space<vmem>>, vector<8x32xf32>,
    %168 = vector.extract_strided_slice %165 {offsets = [0, 32], sizes = [8, 32], strides = [1, 1]} : vector<8x64xf32> to vector<8x32xf32>
    %c8_55 = arith.constant 8 : index
    %c0_56 = arith.constant 0 : index
    %169 = vector.load %arg14[%c8_55, %c0_56] : memref<64x32xf32, #tpu.memory_space<vmem>>, vector<8x32xf32>
    tpu.vector_store %arg14[%c8_55, %c0_56], %168 {strides = array<i32>} : memref<64x32xf32, #tpu.memory_space<vmem>>, vector<8x32xf32>,
    %c56_57 = arith.constant 56 : index
    %c0_58 = arith.constant 0 : index
    %170 = vector.load %arg12[%c56_57, %c0_58] : memref<64x256xf32, #tpu.memory_space<vmem>>, vector<8x256xf32>
    %171 = arith.truncf %165 : vector<8x64xf32> to vector<8x64xbf16>
    %cst_59 = arith.constant dense<0.000000e+00> : vector<8x256xf32>
    %172 = tpu.matmul %171, %7, %cst_59 {dimension_numbers = #tpu.dot_dimension_numbers<[1], [0], [0], [1], [0, 0, 1, 1], [], []>} : vector<8x64xbf16>, vector<64x256xbf16>, vector<8x256xf32> -> vector<8x256xf32>
    %173 = arith.addf %170, %172 : vector<8x256xf32>
    %174 = vector.extract_strided_slice %173 {offsets = [0, 0], sizes = [8, 192], strides = [1, 1]} : vector<8x256xf32> to vector<8x192xf32>
    %175 = arith.negf %174 : vector<8x192xf32>
    %176 = math.exp %175 : vector<8x192xf32>
    %cst_60 = arith.constant 1.000000e+00 : f32
    %177 = vector.broadcast %cst_60 : f32 to vector<8x192xf32>
    %178 = arith.addf %177, %176 : vector<8x192xf32>
    %179 = arith.divf %177, %178 : vector<8x192xf32>
    %180 = vector.extract_strided_slice %179 {offsets = [0, 0], sizes = [8, 64], strides = [1, 1]} : vector<8x192xf32> to vector<8x64xf32>
    %181 = vector.extract_strided_slice %179 {offsets = [0, 64], sizes = [8, 64], strides = [1, 1]} : vector<8x192xf32> to vector<8x64xf32>
    %182 = vector.extract_strided_slice %179 {offsets = [0, 128], sizes = [8, 64], strides = [1, 1]} : vector<8x192xf32> to vector<8x64xf32>
    %183 = vector.extract_strided_slice %173 {offsets = [0, 192], sizes = [8, 64], strides = [1, 1]} : vector<8x256xf32> to vector<8x64xf32>
    %184 = math.tanh %183 : vector<8x64xf32>
    %185 = arith.mulf %181, %163 : vector<8x64xf32>
    %186 = arith.mulf %180, %184 : vector<8x64xf32>
    %187 = arith.addf %185, %186 : vector<8x64xf32>
    %188 = math.tanh %187 : vector<8x64xf32>
    %189 = arith.mulf %182, %188 : vector<8x64xf32>
    %190 = vector.extract_strided_slice %189 {offsets = [0, 0], sizes = [8, 32], strides = [1, 1]} : vector<8x64xf32> to vector<8x32xf32>
    %c56_61 = arith.constant 56 : index
    %c0_62 = arith.constant 0 : index
    %191 = vector.load %arg13[%c56_61, %c0_62] : memref<64x32xf32, #tpu.memory_space<vmem>>, vector<8x32xf32>
    tpu.vector_store %arg13[%c56_61, %c0_62], %190 {strides = array<i32>} : memref<64x32xf32, #tpu.memory_space<vmem>>, vector<8x32xf32>,
    %192 = vector.extract_strided_slice %189 {offsets = [0, 32], sizes = [8, 32], strides = [1, 1]} : vector<8x64xf32> to vector<8x32xf32>
    %c0_63 = arith.constant 0 : index
    %c0_64 = arith.constant 0 : index
    %193 = vector.load %arg14[%c0_63, %c0_64] : memref<64x32xf32, #tpu.memory_space<vmem>>, vector<8x32xf32>
    tpu.vector_store %arg14[%c0_63, %c0_64], %192 {strides = array<i32>} : memref<64x32xf32, #tpu.memory_space<vmem>>, vector<8x32xf32>,
    %c0_65 = arith.constant 0 : index
    %c0_66 = arith.constant 0 : index
    %194 = vector.load %arg13[%c0_65, %c0_66] : memref<64x32xf32, #tpu.memory_space<vmem>>, vector<64x32xf32>
    %195 = arith.truncf %194 : vector<64x32xf32> to vector<64x32xbf16>
    %c0_67 = arith.constant 0 : index
    %c0_68 = arith.constant 0 : index
    %196 = vector.load %arg14[%c0_67, %c0_68] : memref<64x32xf32, #tpu.memory_space<vmem>>, vector<64x32xf32>
    %197 = arith.truncf %196 : vector<64x32xf32> to vector<64x32xbf16>
    %c0_69 = arith.constant 0 : index
    %c0_70 = arith.constant 0 : index
    %198 = vector.load %arg4[%c0_69, %c0_70] : memref<64x128xbf16, #tpu.memory_space<vmem>>, vector<32x128xbf16>
    %cst_71 = arith.constant dense<0.000000e+00> : vector<64x128xf32>
    %199 = tpu.matmul %195, %198, %cst_71 {dimension_numbers = #tpu.dot_dimension_numbers<[1], [0], [0], [1], [0, 0, 1, 1], [], []>} : vector<64x32xbf16>, vector<32x128xbf16>, vector<64x128xf32> -> vector<64x128xf32>
    %c32_72 = arith.constant 32 : index
    %c0_73 = arith.constant 0 : index
    %200 = vector.load %arg4[%c32_72, %c0_73] : memref<64x128xbf16, #tpu.memory_space<vmem>>, vector<32x128xbf16>
    %cst_74 = arith.constant dense<0.000000e+00> : vector<64x128xf32>
    %201 = tpu.matmul %197, %200, %cst_74 {dimension_numbers = #tpu.dot_dimension_numbers<[1], [0], [0], [1], [0, 0, 1, 1], [], []>} : vector<64x32xbf16>, vector<32x128xbf16>, vector<64x128xf32> -> vector<64x128xf32>
    %202 = arith.addf %199, %201 : vector<64x128xf32>
    %c0_75 = arith.constant 0 : index
    %c0_76 = arith.constant 0 : index
    %203 = vector.load %arg5[%c0_75, %c0_76] : memref<1x128xf32, #tpu.memory_space<vmem>>, vector<1x128xf32>
    %204 = vector.broadcast %203 : vector<1x128xf32> to vector<64x128xf32>
    %205 = arith.addf %202, %204 : vector<64x128xf32>
    %c0_77 = arith.constant 0 : index
    %c0_78 = arith.constant 0 : index
    %206 = vector.load %arg15[%c0_77, %c0_78] : memref<64x128xf32, #tpu.memory_space<vmem>>, vector<64x128xf32>
    tpu.vector_store %arg15[%c0_77, %c0_78], %205 {strides = array<i32>} : memref<64x128xf32, #tpu.memory_space<vmem>>, vector<64x128xf32>,
    %207 = vector.extract_strided_slice %195 {offsets = [56, 0], sizes = [8, 32], strides = [1, 1]} : vector<64x32xbf16> to vector<8x32xbf16>
    %c0_79 = arith.constant 0 : index
    %c0_80 = arith.constant 0 : index
    %208 = vector.load %arg7[%c0_79, %c0_80] : memref<64x128xbf16, #tpu.memory_space<vmem>>, vector<32x128xbf16>
    %cst_81 = arith.constant dense<0.000000e+00> : vector<8x128xf32>
    %209 = tpu.matmul %207, %208, %cst_81 {dimension_numbers = #tpu.dot_dimension_numbers<[1], [0], [0], [1], [0, 0, 1, 1], [], []>} : vector<8x32xbf16>, vector<32x128xbf16>, vector<8x128xf32> -> vector<8x128xf32>
    %210 = vector.extract_strided_slice %197 {offsets = [56, 0], sizes = [8, 32], strides = [1, 1]} : vector<64x32xbf16> to vector<8x32xbf16>
    %c32_82 = arith.constant 32 : index
    %c0_83 = arith.constant 0 : index
    %211 = vector.load %arg7[%c32_82, %c0_83] : memref<64x128xbf16, #tpu.memory_space<vmem>>, vector<32x128xbf16>
    %cst_84 = arith.constant dense<0.000000e+00> : vector<8x128xf32>
    %212 = tpu.matmul %210, %211, %cst_84 {dimension_numbers = #tpu.dot_dimension_numbers<[1], [0], [0], [1], [0, 0, 1, 1], [], []>} : vector<8x32xbf16>, vector<32x128xbf16>, vector<8x128xf32> -> vector<8x128xf32>
    %213 = arith.addf %209, %212 : vector<8x128xf32>
    %c0_85 = arith.constant 0 : index
    %c0_86 = arith.constant 0 : index
    %214 = vector.load %arg8[%c0_85, %c0_86] : memref<1x128xf32, #tpu.memory_space<vmem>>, vector<1x128xf32>
    %215 = vector.broadcast %214 : vector<1x128xf32> to vector<8x128xf32>
    %216 = arith.addf %213, %215 : vector<8x128xf32>
    %c0_87 = arith.constant 0 : index
    %c0_88 = arith.constant 0 : index
    %217 = vector.load %arg15[%c0_87, %c0_88] : memref<64x128xf32, #tpu.memory_space<vmem>>, vector<8x128xf32>
    %218 = tpu.concatenate %217, %216 in 0 : vector<8x128xf32>, vector<8x128xf32> -> vector<16x128xf32>
    %219 = vector.extract_strided_slice %218 {offsets = [0, 0], sizes = [16, 96], strides = [1, 1]} : vector<16x128xf32> to vector<16x96xf32>
    %220 = arith.negf %219 : vector<16x96xf32>
    %221 = math.exp %220 : vector<16x96xf32>
    %cst_89 = arith.constant 1.000000e+00 : f32
    %222 = vector.broadcast %cst_89 : f32 to vector<16x96xf32>
    %223 = arith.addf %222, %221 : vector<16x96xf32>
    %224 = arith.divf %222, %223 : vector<16x96xf32>
    %225 = vector.extract_strided_slice %224 {offsets = [0, 0], sizes = [16, 32], strides = [1, 1]} : vector<16x96xf32> to vector<16x32xf32>
    %226 = vector.extract_strided_slice %224 {offsets = [0, 64], sizes = [16, 32], strides = [1, 1]} : vector<16x96xf32> to vector<16x32xf32>
    %227 = vector.extract_strided_slice %218 {offsets = [0, 96], sizes = [16, 32], strides = [1, 1]} : vector<16x128xf32> to vector<16x32xf32>
    %228 = math.tanh %227 : vector<16x32xf32>
    %229 = arith.mulf %225, %228 : vector<16x32xf32>
    %230 = math.tanh %229 : vector<16x32xf32>
    %231 = arith.mulf %226, %230 : vector<16x32xf32>
    %232 = vector.extract_strided_slice %231 {offsets = [0, 0], sizes = [8, 32], strides = [1, 1]} : vector<16x32xf32> to vector<8x32xf32>
    %233 = vector.extract_strided_slice %229 {offsets = [0, 0], sizes = [8, 32], strides = [1, 1]} : vector<16x32xf32> to vector<8x32xf32>
    %234 = vector.extract_strided_slice %231 {offsets = [8, 0], sizes = [8, 32], strides = [1, 1]} : vector<16x32xf32> to vector<8x32xf32>
    %c0_90 = arith.constant 0 : index
    %c0_91 = arith.constant 0 : index
    %235 = vector.load %arg6[%c0_90, %c0_91] : memref<32x128xbf16, #tpu.memory_space<vmem>>, vector<32x128xbf16>
    %c8_92 = arith.constant 8 : index
    %c0_93 = arith.constant 0 : index
    %236 = vector.load %arg15[%c8_92, %c0_93] : memref<64x128xf32, #tpu.memory_space<vmem>>, vector<8x128xf32>
    %237 = arith.truncf %232 : vector<8x32xf32> to vector<8x32xbf16>
    %cst_94 = arith.constant dense<0.000000e+00> : vector<8x128xf32>
    %238 = tpu.matmul %237, %235, %cst_94 {dimension_numbers = #tpu.dot_dimension_numbers<[1], [0], [0], [1], [0, 0, 1, 1], [], []>} : vector<8x32xbf16>, vector<32x128xbf16>, vector<8x128xf32> -> vector<8x128xf32>
    %239 = arith.addf %236, %238 : vector<8x128xf32>
    %240 = vector.extract_strided_slice %239 {offsets = [0, 0], sizes = [8, 96], strides = [1, 1]} : vector<8x128xf32> to vector<8x96xf32>
    %241 = arith.negf %240 : vector<8x96xf32>
    %242 = math.exp %241 : vector<8x96xf32>
    %cst_95 = arith.constant 1.000000e+00 : f32
    %243 = vector.broadcast %cst_95 : f32 to vector<8x96xf32>
    %244 = arith.addf %243, %242 : vector<8x96xf32>
    %245 = arith.divf %243, %244 : vector<8x96xf32>
    %246 = vector.extract_strided_slice %245 {offsets = [0, 0], sizes = [8, 32], strides = [1, 1]} : vector<8x96xf32> to vector<8x32xf32>
    %247 = vector.extract_strided_slice %245 {offsets = [0, 32], sizes = [8, 32], strides = [1, 1]} : vector<8x96xf32> to vector<8x32xf32>
    %248 = vector.extract_strided_slice %245 {offsets = [0, 64], sizes = [8, 32], strides = [1, 1]} : vector<8x96xf32> to vector<8x32xf32>
    %249 = vector.extract_strided_slice %239 {offsets = [0, 96], sizes = [8, 32], strides = [1, 1]} : vector<8x128xf32> to vector<8x32xf32>
    %250 = math.tanh %249 : vector<8x32xf32>
    %251 = arith.mulf %247, %233 : vector<8x32xf32>
    %252 = arith.mulf %246, %250 : vector<8x32xf32>
    %253 = arith.addf %251, %252 : vector<8x32xf32>
    %254 = math.tanh %253 : vector<8x32xf32>
    %255 = arith.mulf %248, %254 : vector<8x32xf32>
    %c16_96 = arith.constant 16 : index
    %c0_97 = arith.constant 0 : index
    %256 = vector.load %arg15[%c16_96, %c0_97] : memref<64x128xf32, #tpu.memory_space<vmem>>, vector<8x128xf32>
    %257 = arith.truncf %255 : vector<8x32xf32> to vector<8x32xbf16>
    %cst_98 = arith.constant dense<0.000000e+00> : vector<8x128xf32>
    %258 = tpu.matmul %257, %235, %cst_98 {dimension_numbers = #tpu.dot_dimension_numbers<[1], [0], [0], [1], [0, 0, 1, 1], [], []>} : vector<8x32xbf16>, vector<32x128xbf16>, vector<8x128xf32> -> vector<8x128xf32>
    %259 = arith.addf %256, %258 : vector<8x128xf32>
    %260 = vector.extract_strided_slice %259 {offsets = [0, 0], sizes = [8, 96], strides = [1, 1]} : vector<8x128xf32> to vector<8x96xf32>
    %261 = arith.negf %260 : vector<8x96xf32>
    %262 = math.exp %261 : vector<8x96xf32>
    %cst_99 = arith.constant 1.000000e+00 : f32
    %263 = vector.broadcast %cst_99 : f32 to vector<8x96xf32>
    %264 = arith.addf %263, %262 : vector<8x96xf32>
    %265 = arith.divf %263, %264 : vector<8x96xf32>
    %266 = vector.extract_strided_slice %265 {offsets = [0, 0], sizes = [8, 32], strides = [1, 1]} : vector<8x96xf32> to vector<8x32xf32>
    %267 = vector.extract_strided_slice %265 {offsets = [0, 32], sizes = [8, 32], strides = [1, 1]} : vector<8x96xf32> to vector<8x32xf32>
    %268 = vector.extract_strided_slice %265 {offsets = [0, 64], sizes = [8, 32], strides = [1, 1]} : vector<8x96xf32> to vector<8x32xf32>
    %269 = vector.extract_strided_slice %259 {offsets = [0, 96], sizes = [8, 32], strides = [1, 1]} : vector<8x128xf32> to vector<8x32xf32>
    %270 = math.tanh %269 : vector<8x32xf32>
    %271 = arith.mulf %267, %253 : vector<8x32xf32>
    %272 = arith.mulf %266, %270 : vector<8x32xf32>
    %273 = arith.addf %271, %272 : vector<8x32xf32>
    %274 = math.tanh %273 : vector<8x32xf32>
    %275 = arith.mulf %268, %274 : vector<8x32xf32>
    %c24_100 = arith.constant 24 : index
    %c0_101 = arith.constant 0 : index
    %276 = vector.load %arg15[%c24_100, %c0_101] : memref<64x128xf32, #tpu.memory_space<vmem>>, vector<8x128xf32>
    %277 = arith.truncf %275 : vector<8x32xf32> to vector<8x32xbf16>
    %cst_102 = arith.constant dense<0.000000e+00> : vector<8x128xf32>
    %278 = tpu.matmul %277, %235, %cst_102 {dimension_numbers = #tpu.dot_dimension_numbers<[1], [0], [0], [1], [0, 0, 1, 1], [], []>} : vector<8x32xbf16>, vector<32x128xbf16>, vector<8x128xf32> -> vector<8x128xf32>
    %279 = arith.addf %276, %278 : vector<8x128xf32>
    %280 = vector.extract_strided_slice %279 {offsets = [0, 0], sizes = [8, 96], strides = [1, 1]} : vector<8x128xf32> to vector<8x96xf32>
    %281 = arith.negf %280 : vector<8x96xf32>
    %282 = math.exp %281 : vector<8x96xf32>
    %cst_103 = arith.constant 1.000000e+00 : f32
    %283 = vector.broadcast %cst_103 : f32 to vector<8x96xf32>
    %284 = arith.addf %283, %282 : vector<8x96xf32>
    %285 = arith.divf %283, %284 : vector<8x96xf32>
    %286 = vector.extract_strided_slice %285 {offsets = [0, 0], sizes = [8, 32], strides = [1, 1]} : vector<8x96xf32> to vector<8x32xf32>
    %287 = vector.extract_strided_slice %285 {offsets = [0, 32], sizes = [8, 32], strides = [1, 1]} : vector<8x96xf32> to vector<8x32xf32>
    %288 = vector.extract_strided_slice %285 {offsets = [0, 64], sizes = [8, 32], strides = [1, 1]} : vector<8x96xf32> to vector<8x32xf32>
    %289 = vector.extract_strided_slice %279 {offsets = [0, 96], sizes = [8, 32], strides = [1, 1]} : vector<8x128xf32> to vector<8x32xf32>
    %290 = math.tanh %289 : vector<8x32xf32>
    %291 = arith.mulf %287, %273 : vector<8x32xf32>
    %292 = arith.mulf %286, %290 : vector<8x32xf32>
    %293 = arith.addf %291, %292 : vector<8x32xf32>
    %294 = math.tanh %293 : vector<8x32xf32>
    %295 = arith.mulf %288, %294 : vector<8x32xf32>
    %c32_104 = arith.constant 32 : index
    %c0_105 = arith.constant 0 : index
    %296 = vector.load %arg15[%c32_104, %c0_105] : memref<64x128xf32, #tpu.memory_space<vmem>>, vector<8x128xf32>
    %297 = arith.truncf %295 : vector<8x32xf32> to vector<8x32xbf16>
    %cst_106 = arith.constant dense<0.000000e+00> : vector<8x128xf32>
    %298 = tpu.matmul %297, %235, %cst_106 {dimension_numbers = #tpu.dot_dimension_numbers<[1], [0], [0], [1], [0, 0, 1, 1], [], []>} : vector<8x32xbf16>, vector<32x128xbf16>, vector<8x128xf32> -> vector<8x128xf32>
    %299 = arith.addf %296, %298 : vector<8x128xf32>
    %300 = vector.extract_strided_slice %299 {offsets = [0, 0], sizes = [8, 96], strides = [1, 1]} : vector<8x128xf32> to vector<8x96xf32>
    %301 = arith.negf %300 : vector<8x96xf32>
    %302 = math.exp %301 : vector<8x96xf32>
    %cst_107 = arith.constant 1.000000e+00 : f32
    %303 = vector.broadcast %cst_107 : f32 to vector<8x96xf32>
    %304 = arith.addf %303, %302 : vector<8x96xf32>
    %305 = arith.divf %303, %304 : vector<8x96xf32>
    %306 = vector.extract_strided_slice %305 {offsets = [0, 0], sizes = [8, 32], strides = [1, 1]} : vector<8x96xf32> to vector<8x32xf32>
    %307 = vector.extract_strided_slice %305 {offsets = [0, 32], sizes = [8, 32], strides = [1, 1]} : vector<8x96xf32> to vector<8x32xf32>
    %308 = vector.extract_strided_slice %305 {offsets = [0, 64], sizes = [8, 32], strides = [1, 1]} : vector<8x96xf32> to vector<8x32xf32>
    %309 = vector.extract_strided_slice %299 {offsets = [0, 96], sizes = [8, 32], strides = [1, 1]} : vector<8x128xf32> to vector<8x32xf32>
    %310 = math.tanh %309 : vector<8x32xf32>
    %311 = arith.mulf %307, %293 : vector<8x32xf32>
    %312 = arith.mulf %306, %310 : vector<8x32xf32>
    %313 = arith.addf %311, %312 : vector<8x32xf32>
    %314 = math.tanh %313 : vector<8x32xf32>
    %315 = arith.mulf %308, %314 : vector<8x32xf32>
    %c40_108 = arith.constant 40 : index
    %c0_109 = arith.constant 0 : index
    %316 = vector.load %arg15[%c40_108, %c0_109] : memref<64x128xf32, #tpu.memory_space<vmem>>, vector<8x128xf32>
    %317 = arith.truncf %315 : vector<8x32xf32> to vector<8x32xbf16>
    %cst_110 = arith.constant dense<0.000000e+00> : vector<8x128xf32>
    %318 = tpu.matmul %317, %235, %cst_110 {dimension_numbers = #tpu.dot_dimension_numbers<[1], [0], [0], [1], [0, 0, 1, 1], [], []>} : vector<8x32xbf16>, vector<32x128xbf16>, vector<8x128xf32> -> vector<8x128xf32>
    %319 = arith.addf %316, %318 : vector<8x128xf32>
    %320 = vector.extract_strided_slice %319 {offsets = [0, 0], sizes = [8, 96], strides = [1, 1]} : vector<8x128xf32> to vector<8x96xf32>
    %321 = arith.negf %320 : vector<8x96xf32>
    %322 = math.exp %321 : vector<8x96xf32>
    %cst_111 = arith.constant 1.000000e+00 : f32
    %323 = vector.broadcast %cst_111 : f32 to vector<8x96xf32>
    %324 = arith.addf %323, %322 : vector<8x96xf32>
    %325 = arith.divf %323, %324 : vector<8x96xf32>
    %326 = vector.extract_strided_slice %325 {offsets = [0, 0], sizes = [8, 32], strides = [1, 1]} : vector<8x96xf32> to vector<8x32xf32>
    %327 = vector.extract_strided_slice %325 {offsets = [0, 32], sizes = [8, 32], strides = [1, 1]} : vector<8x96xf32> to vector<8x32xf32>
    %328 = vector.extract_strided_slice %325 {offsets = [0, 64], sizes = [8, 32], strides = [1, 1]} : vector<8x96xf32> to vector<8x32xf32>
    %329 = vector.extract_strided_slice %319 {offsets = [0, 96], sizes = [8, 32], strides = [1, 1]} : vector<8x128xf32> to vector<8x32xf32>
    %330 = math.tanh %329 : vector<8x32xf32>
    %331 = arith.mulf %327, %313 : vector<8x32xf32>
    %332 = arith.mulf %326, %330 : vector<8x32xf32>
    %333 = arith.addf %331, %332 : vector<8x32xf32>
    %334 = math.tanh %333 : vector<8x32xf32>
    %335 = arith.mulf %328, %334 : vector<8x32xf32>
    %c48_112 = arith.constant 48 : index
    %c0_113 = arith.constant 0 : index
    %336 = vector.load %arg15[%c48_112, %c0_113] : memref<64x128xf32, #tpu.memory_space<vmem>>, vector<8x128xf32>
    %337 = arith.truncf %335 : vector<8x32xf32> to vector<8x32xbf16>
    %cst_114 = arith.constant dense<0.000000e+00> : vector<8x128xf32>
    %338 = tpu.matmul %337, %235, %cst_114 {dimension_numbers = #tpu.dot_dimension_numbers<[1], [0], [0], [1], [0, 0, 1, 1], [], []>} : vector<8x32xbf16>, vector<32x128xbf16>, vector<8x128xf32> -> vector<8x128xf32>
    %339 = arith.addf %336, %338 : vector<8x128xf32>
    %340 = vector.extract_strided_slice %339 {offsets = [0, 0], sizes = [8, 96], strides = [1, 1]} : vector<8x128xf32> to vector<8x96xf32>
    %341 = arith.negf %340 : vector<8x96xf32>
    %342 = math.exp %341 : vector<8x96xf32>
    %cst_115 = arith.constant 1.000000e+00 : f32
    %343 = vector.broadcast %cst_115 : f32 to vector<8x96xf32>
    %344 = arith.addf %343, %342 : vector<8x96xf32>
    %345 = arith.divf %343, %344 : vector<8x96xf32>
    %346 = vector.extract_strided_slice %345 {offsets = [0, 0], sizes = [8, 32], strides = [1, 1]} : vector<8x96xf32> to vector<8x32xf32>
    %347 = vector.extract_strided_slice %345 {offsets = [0, 32], sizes = [8, 32], strides = [1, 1]} : vector<8x96xf32> to vector<8x32xf32>
    %348 = vector.extract_strided_slice %345 {offsets = [0, 64], sizes = [8, 32], strides = [1, 1]} : vector<8x96xf32> to vector<8x32xf32>
    %349 = vector.extract_strided_slice %339 {offsets = [0, 96], sizes = [8, 32], strides = [1, 1]} : vector<8x128xf32> to vector<8x32xf32>
    %350 = math.tanh %349 : vector<8x32xf32>
    %351 = arith.mulf %347, %333 : vector<8x32xf32>
    %352 = arith.mulf %346, %350 : vector<8x32xf32>
    %353 = arith.addf %351, %352 : vector<8x32xf32>
    %354 = math.tanh %353 : vector<8x32xf32>
    %355 = arith.mulf %348, %354 : vector<8x32xf32>
    %c56_116 = arith.constant 56 : index
    %c0_117 = arith.constant 0 : index
    %356 = vector.load %arg15[%c56_116, %c0_117] : memref<64x128xf32, #tpu.memory_space<vmem>>, vector<8x128xf32>
    %357 = arith.truncf %355 : vector<8x32xf32> to vector<8x32xbf16>
    %cst_118 = arith.constant dense<0.000000e+00> : vector<8x128xf32>
    %358 = tpu.matmul %357, %235, %cst_118 {dimension_numbers = #tpu.dot_dimension_numbers<[1], [0], [0], [1], [0, 0, 1, 1], [], []>} : vector<8x32xbf16>, vector<32x128xbf16>, vector<8x128xf32> -> vector<8x128xf32>
    %359 = arith.addf %356, %358 : vector<8x128xf32>
    %360 = vector.extract_strided_slice %359 {offsets = [0, 0], sizes = [8, 96], strides = [1, 1]} : vector<8x128xf32> to vector<8x96xf32>
    %361 = arith.negf %360 : vector<8x96xf32>
    %362 = math.exp %361 : vector<8x96xf32>
    %cst_119 = arith.constant 1.000000e+00 : f32
    %363 = vector.broadcast %cst_119 : f32 to vector<8x96xf32>
    %364 = arith.addf %363, %362 : vector<8x96xf32>
    %365 = arith.divf %363, %364 : vector<8x96xf32>
    %366 = vector.extract_strided_slice %365 {offsets = [0, 0], sizes = [8, 32], strides = [1, 1]} : vector<8x96xf32> to vector<8x32xf32>
    %367 = vector.extract_strided_slice %365 {offsets = [0, 32], sizes = [8, 32], strides = [1, 1]} : vector<8x96xf32> to vector<8x32xf32>
    %368 = vector.extract_strided_slice %365 {offsets = [0, 64], sizes = [8, 32], strides = [1, 1]} : vector<8x96xf32> to vector<8x32xf32>
    %369 = vector.extract_strided_slice %359 {offsets = [0, 96], sizes = [8, 32], strides = [1, 1]} : vector<8x128xf32> to vector<8x32xf32>
    %370 = math.tanh %369 : vector<8x32xf32>
    %371 = arith.mulf %367, %353 : vector<8x32xf32>
    %372 = arith.mulf %366, %370 : vector<8x32xf32>
    %373 = arith.addf %371, %372 : vector<8x32xf32>
    %374 = math.tanh %373 : vector<8x32xf32>
    %375 = arith.mulf %368, %374 : vector<8x32xf32>
    %376 = arith.truncf %375 : vector<8x32xf32> to vector<8x32xbf16>
    %c0_120 = arith.constant 0 : index
    %c0_121 = arith.constant 0 : index
    %377 = vector.load %arg9[%c0_120, %c0_121] : memref<64x2xbf16, #tpu.memory_space<vmem>>, vector<32x2xbf16>
    %cst_122 = arith.constant dense<0.000000e+00> : vector<8x2xf32>
    %378 = tpu.matmul %376, %377, %cst_122 {dimension_numbers = #tpu.dot_dimension_numbers<[1], [0], [0], [1], [0, 0, 1, 1], [], []>} : vector<8x32xbf16>, vector<32x2xbf16>, vector<8x2xf32> -> vector<8x2xf32>
    %379 = arith.truncf %234 : vector<8x32xf32> to vector<8x32xbf16>
    %c32_123 = arith.constant 32 : index
    %c0_124 = arith.constant 0 : index
    %380 = vector.load %arg9[%c32_123, %c0_124] : memref<64x2xbf16, #tpu.memory_space<vmem>>, vector<32x2xbf16>
    %cst_125 = arith.constant dense<0.000000e+00> : vector<8x2xf32>
    %381 = tpu.matmul %379, %380, %cst_125 {dimension_numbers = #tpu.dot_dimension_numbers<[1], [0], [0], [1], [0, 0, 1, 1], [], []>} : vector<8x32xbf16>, vector<32x2xbf16>, vector<8x2xf32> -> vector<8x2xf32>
    %382 = arith.addf %378, %381 : vector<8x2xf32>
    %c0_126 = arith.constant 0 : index
    %c0_127 = arith.constant 0 : index
    %383 = vector.load %arg10[%c0_126, %c0_127] : memref<1x2xf32, #tpu.memory_space<vmem>>, vector<1x2xf32>
    %384 = vector.broadcast %383 : vector<1x2xf32> to vector<8x2xf32>
    %385 = arith.addf %382, %384 : vector<8x2xf32>
    %c0_128 = arith.constant 0 : index
    %c0_129 = arith.constant 0 : index
    %386 = vector.load %arg11[%c0_128, %c0_129] : memref<8x2xf32, #tpu.memory_space<vmem>>, vector<8x2xf32>
    tpu.vector_store %arg11[%c0_128, %c0_129], %385 {strides = array<i32>} : memref<8x2xf32, #tpu.memory_space<vmem>>, vector<8x2xf32>,
    return
  }
}

</mosaic_0001>

<bundles_post_ra>
// kernel: bilstm_forward.1
= control target key start
LH: loop header
LB: loop body
LE: loop exit
PB: predicated region body
PF: predicated region fallthrough
CT: control target
= control target key end

     0   :  { %vm102_vm0 = vcmask 1041408   ;;  %v2401_v1 = vmov 0   ;;  %vm89_vm1 = vcmask 31744   ;;  %v50_v5 = vlaneseq  ;;  %s2402_s18 = smov 64   ;;  %s2933_s1 = inlined_call_operand.vmem [shape: bf16[4,256], index: 1, kind: input, shape index: {}]   ;;  %s2934_s0 = inlined_call_operand.vmem [shape: bf16[64,4], index: 0, kind: input, shape index: {}]   ;;  %s2935_s2 = inlined_call_operand.vmem [shape: f32[1,256], index: 2, kind: input, shape index: {}]   ;;  %s2936_s3 = inlined_call_operand.vmem [shape: bf16[64,256], index: 3, kind: input, shape index: {}]   ;;  %s2937_s4 = inlined_call_operand.vmem [shape: bf16[64,128], index: 4, kind: input, shape index: {}]   ;;  %s2938_s7 = inlined_call_operand.vmem [shape: bf16[64,128], index: 7, kind: input, shape index: {}]   ;;  %s2939_s5 = inlined_call_operand.vmem [shape: f32[1,128], index: 5, kind: input, shape index: {}]   ;;  %s2940_s6 = inlined_call_operand.vmem [shape: bf16[32,128], index: 6, kind: input, shape index: {}]   ;;  %s2941_s8 = inlined_call_operand.vmem [shape: f32[1,128], index: 8, kind: input, shape index: {}]   ;;  %s2942_s9 = inlined_call_operand.vmem [shape: bf16[64,2], index: 9, kind: input, shape index: {}]   ;;  %s2943_s10 = inlined_call_operand.vmem [shape: f32[1,2], index: 10, kind: input, shape index: {}]   ;;  %s2944_s11 = inlined_call_operand.vmem [shape: f32[8,2], index: 11, kind: output, shape index: {}]  }
   0x1   :  { %v1950_v0 = vld.sshfl [vmem:[%s2933_s1] sm:$0x33 pattern:$0x76325410]  ;;  %141 = vmatprep.mubr.bf16.mxu0 %v2401_v1  ;;  %314 = vmatprep.mubr.bf16.mxu1 %v2401_v1  ;;  %v2485_v12 = vld [vmem:[%s2936_s3 + $0x4] ss:$8 sps:$4 sm:$0xff]  }
   0x2   :  { %v88_v2 = vcombine.high %v1950_v0, %v1950_v0  ;;  %v104_v3 = vsel %vm102_vm0, %v1950_v0, 0  ;;  %v2203_v4 = vld [vmem:[%s2934_s0] sm:$0xff]   ;;  %v51_v6 = vshrl.u32 %v50_v5, 7  ;;  %282 = vmatprep.subr.bf16.mxu1 %v2485_v12  ;;  %v2503_v17 = vld [vmem:[%s2936_s3 + $0x14] ss:$8 sps:$4 sm:$0xff]   ;;  %vm228_vm2 = vcmask 261120  }
   0x3   :  { %v48_v8 = vld [vmem:[%s2935_s2] sm:$0x3]  ;;  %v2508_v18 = vld [vmem:[%s2936_s3 + $0x10] ss:$8 sps:$4 sm:$0xff]   ;;  %v2514_v19 = vld [vmem:[%s2936_s3 + $0x24] ss:$8 sps:$4 sm:$0xff]  }
   0x4   :  { %1951 = vmatprep.subr.msk.bf16.mxu0 %vm102_vm0, %v88_v2  ;;  %v56_v7 = vsub.s32 1, %v51_v6  ;;  %v2493_v15 = vld [vmem:[%s2936_s3] ss:$8 sps:$4 sm:$0xff]   ;;  %v2529_v21 = vld [vmem:[%s2936_s3 + $0x34] ss:$8 sps:$4 sm:$0xff]   ;;  %v52_v24 = vsub.s32 0, %v51_v6 }
   0x5   :  { %110 = vmatpush1.bf16.msra.mxu0 %v104_v3  ;;  %283 = vmatpush1.bf16.msra.mxu1 %v2493_v15  ;;  %v2522_v20 = vld [vmem:[%s2936_s3 + $0x20] ss:$8 sps:$4 sm:$0xff]   ;;  %v2536_v22 = vld [vmem:[%s2936_s3 + $0x30] ss:$8 sps:$4 sm:$0xff]   ;;  %vm278_vm3 = vcmask 523264   ;;  %vm2405_vm4 = vmmov 0  }
   0x6   :  { %v2480_v9 = vrot.slane %v48_v8, %v56_v7  ;;  %456 = vmatprep.subr.bf16.mxu0 %v2485_v12  ;;  %284 = vmatprep.subr.bf16.mxu1 %v2503_v17  ;;  %v2546_v25 = vrot.slane %v48_v8, %v52_v24  ;;  %v2216_v55 = vld [vmem:[%s2934_s0 + $0x8] sm:$0xff]   ;;  %vm1940_vm5 = vcmask 15360  }
   0x8   :  { %1952 = vmatmul.mubr.msk.bf16.vlgmr.msra.gmra.mrb[0].mxu0 %vm89_vm1, %v2203_v4 }
   0x9   :  { %151 = vmatprep.mubr.bf16.mxu0 %v2401_v1  ;;  %457 = vmatpush1.bf16.msra.mxu0 %v2493_v15 }
   0xa   :  { %458 = vmatprep.subr.bf16.mxu0 %v2503_v17  ;;  %285 = vmatpush1.bf16.msra.mxu1 %v2508_v18 }
   0xb   :  { %286 = vmatprep.subr.bf16.mxu1 %v2514_v19 }
   0xd   :  { %459 = vmatpush1.bf16.msra.mxu0 %v2508_v18 }
   0xe   :  { %460 = vmatprep.subr.bf16.mxu0 %v2514_v19  ;;  %287 = vmatpush1.bf16.msra.mxu1 %v2522_v20 }
   0xf   :  { %288 = vmatprep.subr.bf16.mxu1 %v2529_v21 }
  0x10   :  { %1953 = vmatmul.mubr.msk.bf16.gmra.mrb[4].mxu0 %vm89_vm1, %v2216_v55 }
  0x11   :  { %461 = vmatpush1.bf16.msra.mxu0 %v2522_v20  ;;  %161 = vmatprep.mubr.bf16.mxu0 %v2401_v1 }
  0x12   :  { %462 = vmatprep.subr.bf16.mxu0 %v2529_v21  ;;  %289 = vmatpush1.bf16.msra.mxu1 %v2536_v22 }
  0x13   :  { %371 = vmatprep.subr.bf16.mxu1 %v2485_v12 }
  0x15   :  { %463 = vmatpush1.bf16.msra.mxu0 %v2536_v22 }
  0x16   :  { %626 = vmatprep.subr.bf16.mxu0 %v2485_v12 }
  0xdb   :  { %v143_v10 = vpop.f32.mrb[0].mxu0 }
  0xdc   :  { %v145_v11 = vpop.f32.mrb[1].mxu0  ;;  %v144_v26 = vadd.f32 %v143_v10, %v2546_v25 }
  0xdd   :  { %v146_v13 = vadd.f32 %v145_v11, %v2480_v9  ;;  %v2488_v14 = vpop.f32.mrb[2].mxu0 }
  0xde   :  { %v2495_v16 = vpop.f32.mrb[3].mxu0  ;;  %v1956_v27 = vmul.f32 -1.442695, %v144_v26  ;;  %v148_v40 = vadd.f32 %v2488_v14, %v2546_v25 }
  0xdf   :  { %2233 = vtanh.f32 %v146_v13  ;;  %v1957_v28 = vmul.f32 -1.442695, %v146_v13  ;;  %v150_v41 = vadd.f32 %v2495_v16, %v2480_v9 }
  0xe0   :  { %2235 = vpow2.f32 %v1956_v27 }
  0xe1   :  { %2237 = vpow2.f32 %v1957_v28 }
  0xe3   :  { %v153_v62 = vpop.f32.mrb[4].mxu0 }
  0xe4   :  { %v155_v63 = vpop.f32.mrb[5].mxu0  ;;  %v154_v10 = vadd.f32 %v153_v62, %v2546_v25 }
  0xe5   :  { %v2578_v0 = vpop.f32.mrb[6].mxu0  ;;  %v156_v11 = vadd.f32 %v155_v63, %v2480_v9 }
  0xe6   :  { %v2580_v2 = vpop.f32.mrb[7].mxu0 }
  0xe9   :  { %v2234_v23 = vpop.eup %2233 }
  0xea   :  { %222 = vrot.lane.b32.xlu0 %v2234_v23, %s2402_s18  ;;  %v2236_v29 = vpop.eup %2235 }
  0xeb   :  { %v214_v30 = vadd.f32 1.0, %v2236_v29  ;;  %v2238_v31 = vpop.eup %2237 }
  0xec   :  { %v215_v32 = vadd.f32 1.0, %v2238_v31 }
  0xed   :  { %2239 = vrcp.f32 %v214_v30 }
  0xee   :  { %2241 = vrcp.f32 %v215_v32 }
  0xf7   :  { %v2240_v33 = vpop.eup %2239 }
  0xf8   :  { %v2242_v36 = vpop.eup %2241 }
 0x15c   :  { %v223_v34 = vpop.permute.xlu0 %222 }
 0x15d   :  { %v225_v35 = vmul.f32 %v2240_v33, %v223_v34  ;;  %v2217_v34 = vld [vmem:[%s2934_s0 + $0x10] sm:$0xff]  }
 0x15e   :  { %1954 = vmatmul.mubr.msk.bf16.gmra.mrb[8].mxu0 %vm89_vm1, %v2217_v34 }
 0x15f   :  { %2243 = vtanh.f32 %v225_v35  ;;  %339 = vrot.lane.b32.xlu1 %v225_v35, %s2402_s18  ;;  %171 = vmatprep.mubr.bf16.mxu0 %v2401_v1  ;;  %v2218_v35 = vld [vmem:[%s2934_s0 + $0x18] sm:$0xff]   ;;  %s2403_s0 = smov 96  }
 0x166   :  { %1955 = vmatmul.mubr.msk.bf16.gmra.mrb[12].mxu0 %vm89_vm1, %v2218_v35 }
 0x167   :  { %488 = vmatprep.mubr.bf16.mxu0 %v2401_v1 }
 0x169   :  { %v2244_v37 = vpop.eup %2243 }
 0x16a   :  { %v2550_v38 = vmul.f32 %v2244_v37, %v2242_v36 }
 0x16c   :  { %229 = vst.msk [vmem:[#allocation3] sm:$0xff] %vm228_vm2, %v2550_v38  ;;  %v237_v39 = vpack.c.bf16 %v2550_v38, %v2550_v38 }
 0x16e   :  { %1966 = vmatmul.mubr.msk.bf16.vlgmr.msra.gmra.mrb[0].mxu1 %vm278_vm3, %v237_v39 }
 0x16f   :  { %372 = vmatpush1.bf16.msra.mxu1 %v2493_v15  ;;  %403 = vmatprep.mubr.bf16.mxu1 %v2401_v1 }
 0x170   :  { %373 = vmatprep.subr.bf16.mxu1 %v2503_v17 }
 0x173   :  { %374 = vmatpush1.bf16.msra.mxu1 %v2508_v18 }
 0x174   :  { %375 = vmatprep.subr.bf16.mxu1 %v2514_v19 }
 0x177   :  { %376 = vmatpush1.bf16.msra.mxu1 %v2522_v20 }
 0x178   :  { %377 = vmatprep.subr.bf16.mxu1 %v2529_v21 }
 0x17b   :  { %378 = vmatpush1.bf16.msra.mxu1 %v2536_v22 }
 0x17c   :  { %541 = vmatprep.subr.bf16.mxu1 %v2485_v12 }
 0x1d1   :  { %v340_v56 = vpop.permute.xlu1 %339 }
 0x241   :  { %v316_v42 = vpop.f32.mrb[0].mxu1 }
 0x242   :  { %v323_v43 = vadd.f32 %v316_v42, %v148_v40  ;;  %v318_v44 = vpop.f32.mrb[1].mxu1  ;;  %v2613_v42 = vpop.f32.mrb[8].mxu0 }
 0x243   :  { %v324_v45 = vadd.f32 %v318_v44, %v150_v41  ;;  %v320_v46 = vpop.f32.mrb[2].mxu1 }
 0x244   :  { %v321_v47 = vpop.f32.mrb[3].mxu1  ;;  %v1967_v49 = vmul.f32 -1.442695, %v323_v43  ;;  %v2615_v43 = vpop.f32.mrb[9].mxu0 }
 0x245   :  { %2245 = vtanh.f32 %v324_v45  ;;  %v1968_v61 = vmul.f32 -1.442695, %v324_v45  ;;  %v2617_v44 = vpop.f32.mrb[10].mxu0 }
 0x246   :  { %2247 = vpow2.f32 %v1967_v49  ;;  %v2619_v45 = vpop.f32.mrb[11].mxu0 }
 0x247   :  { %v2621_v46 = vpop.f32.mrb[12].mxu0 }
 0x248   :  { %v2623_v47 = vpop.f32.mrb[13].mxu0 }
 0x24f   :  { %v2246_v48 = vpop.eup %2245 }
 0x250   :  { %344 = vrot.lane.b32.xlu0 %v2246_v48, %s2402_s18  ;;  %v2248_v50 = vpop.eup %2247  ;;  %v2625_v48 = vpop.f32.mrb[14].mxu0 }
 0x251   :  { %v331_v51 = vadd.f32 1.0, %v2248_v50  ;;  %v2627_v49 = vpop.f32.mrb[15].mxu0 }
 0x253   :  { %2249 = vrcp.f32 %v331_v51 }
 0x25d   :  { %v2250_v52 = vpop.eup %2249 }
 0x25e   :  { %v342_v57 = vmul.f32 %v2250_v52, %v340_v56  ;;  %v158_v56 = vadd.f32 %v2578_v0, %v2546_v25 }
 0x2c2   :  { %v345_v53 = vpop.permute.xlu0 %344 }
 0x2c3   :  { %v347_v54 = vmul.f32 %v2250_v52, %v345_v53 }
 0x2c5   :  { %349 = vrot.lane.b32.xlu1 %v347_v54, %s2402_s18 }
 0x337   :  { %v350_v58 = vpop.permute.xlu1 %349 }
 0x338   :  { %v352_v59 = vadd.f32 %v350_v58, %v342_v57  ;;  %v160_v57 = vadd.f32 %v2580_v2, %v2480_v9 }
 0x33a   :  { %2251 = vtanh.f32 %v352_v59 }
 0x33b   :  { %2253 = vpow2.f32 %v1968_v61 }
 0x344   :  { %v2252_v60 = vpop.eup %2251 }
 0x345   :  { %355 = vrot.lane.b32.xlu0 %v2252_v60, %s2402_s18  ;;  %v2254_v3 = vpop.eup %2253 }
 0x346   :  { %v332_v4 = vadd.f32 1.0, %v2254_v3 }
 0x348   :  { %2255 = vrcp.f32 %v332_v4 }
 0x352   :  { %v2256_v5 = vpop.eup %2255 }
 0x3b7   :  { %v356_v6 = vpop.permute.xlu0 %355 }
 0x3b8   :  { %v2582_v7 = vmul.f32 %v2256_v5, %v356_v6 }
 0x3ba   :  { %359 = vst.msk [vmem:[#allocation3 + $0x8] sm:$0xff] %vm228_vm2, %v2582_v7  ;;  %v367_v8 = vpack.c.bf16 %v2582_v7, %v2582_v7 }
 0x3bc   :  { %1969 = vmatmul.mubr.msk.bf16.vlgmr.msra.gmra.mrb[4].mxu1 %vm278_vm3, %v367_v8 }
 0x3bd   :  { %542 = vmatpush1.bf16.msra.mxu1 %v2493_v15  ;;  %573 = vmatprep.mubr.bf16.mxu1 %v2401_v1 }
 0x3be   :  { %543 = vmatprep.subr.bf16.mxu1 %v2503_v17 }
 0x3c1   :  { %544 = vmatpush1.bf16.msra.mxu1 %v2508_v18 }
 0x3c2   :  { %545 = vmatprep.subr.bf16.mxu1 %v2514_v19 }
 0x3c5   :  { %546 = vmatpush1.bf16.msra.mxu1 %v2522_v20 }
 0x3c6   :  { %547 = vmatprep.subr.bf16.mxu1 %v2529_v21 }
 0x3c9   :  { %548 = vmatpush1.bf16.msra.mxu1 %v2536_v22 }
 0x3ca   :  { %711 = vmatprep.subr.bf16.mxu1 %v2485_v12 }
 0x48f   :  { %v405_v13 = vpop.f32.mrb[4].mxu1 }
 0x490   :  { %v412_v14 = vadd.f32 %v405_v13, %v154_v10  ;;  %v407_v16 = vpop.f32.mrb[5].mxu1 }
 0x491   :  { %v413_v23 = vadd.f32 %v407_v16, %v156_v11  ;;  %v409_v24 = vpop.f32.mrb[6].mxu1 }
 0x492   :  { %v410_v26 = vpop.f32.mrb[7].mxu1  ;;  %v1970_v28 = vmul.f32 -1.442695, %v412_v14 }
 0x493   :  { %2257 = vtanh.f32 %v413_v23  ;;  %v1971_v41 = vmul.f32 -1.442695, %v413_v23 }
 0x494   :  { %2259 = vpow2.f32 %v1970_v28 }
 0x49d   :  { %v2258_v27 = vpop.eup %2257 }
 0x49e   :  { %429 = vrot.lane.b32.xlu1 %v2258_v27, %s2402_s18  ;;  %v2260_v29 = vpop.eup %2259 }
 0x49f   :  { %v420_v30 = vadd.f32 1.0, %v2260_v29  ;;  %v164_v29 = vadd.f32 %v2613_v42, %v2546_v25 }
 0x4a1   :  { %2261 = vrcp.f32 %v420_v30  ;;  %v166_v30 = vadd.f32 %v2615_v43, %v2480_v9 }
 0x4ab   :  { %v2262_v31 = vpop.eup %2261 }
 0x4ac   :  { %v427_v36 = vmul.f32 %v2262_v31, %v352_v59 }
 0x510   :  { %v430_v32 = vpop.permute.xlu1 %429 }
 0x511   :  { %v432_v33 = vmul.f32 %v2262_v31, %v430_v32 }
 0x513   :  { %434 = vrot.lane.b32.xlu0 %v432_v33, %s2402_s18 }
 0x585   :  { %v435_v37 = vpop.permute.xlu0 %434 }
 0x586   :  { %v437_v39 = vadd.f32 %v435_v37, %v427_v36 }
 0x588   :  { %2263 = vtanh.f32 %v437_v39 }
 0x589   :  { %2265 = vpow2.f32 %v1971_v41 }
 0x592   :  { %v2264_v40 = vpop.eup %2263 }
 0x593   :  { %440 = vrot.lane.b32.xlu1 %v2264_v40, %s2402_s18  ;;  %v2266_v50 = vpop.eup %2265 }
 0x594   :  { %v421_v51 = vadd.f32 1.0, %v2266_v50 }
 0x596   :  { %2267 = vrcp.f32 %v421_v51 }
 0x5a0   :  { %v2268_v52 = vpop.eup %2267 }
 0x605   :  { %v441_v53 = vpop.permute.xlu1 %440 }
 0x606   :  { %v2629_v54 = vmul.f32 %v2268_v52, %v441_v53 }
 0x608   :  { %444 = vst.msk [vmem:[#allocation3 + $0x10] sm:$0xff] %vm228_vm2, %v2629_v54  ;;  %v452_v55 = vpack.c.bf16 %v2629_v54, %v2629_v54 }
 0x60a   :  { %1972 = vmatmul.mubr.msk.bf16.vlgmr.msra.gmra.mrb[16].mxu0 %vm278_vm3, %v452_v55 }
 0x60b   :  { %627 = vmatpush1.bf16.msra.mxu0 %v2493_v15  ;;  %658 = vmatprep.mubr.bf16.mxu0 %v2401_v1 }
 0x60c   :  { %628 = vmatprep.subr.bf16.mxu0 %v2503_v17 }
 0x60f   :  { %629 = vmatpush1.bf16.msra.mxu0 %v2508_v18 }
 0x610   :  { %630 = vmatprep.subr.bf16.mxu0 %v2514_v19 }
 0x613   :  { %631 = vmatpush1.bf16.msra.mxu0 %v2522_v20 }
 0x614   :  { %632 = vmatprep.subr.bf16.mxu0 %v2529_v21 }
 0x617   :  { %633 = vmatpush1.bf16.msra.mxu0 %v2536_v22 }
 0x618   :  { %796 = vmatprep.subr.bf16.mxu0 %v2485_v12 }
 0x6dd   :  { %v490_v58 = vpop.f32.mrb[16].mxu0 }
 0x6de   :  { %v497_v59 = vadd.f32 %v490_v58, %v158_v56  ;;  %v492_v60 = vpop.f32.mrb[17].mxu0 }
 0x6df   :  { %v498_v61 = vadd.f32 %v492_v60, %v160_v57  ;;  %v494_v62 = vpop.f32.mrb[18].mxu0 }
 0x6e0   :  { %v495_v63 = vpop.f32.mrb[19].mxu0  ;;  %v1973_v4 = vmul.f32 -1.442695, %v497_v59 }
 0x6e1   :  { %2269 = vtanh.f32 %v498_v61  ;;  %v1974_v14 = vmul.f32 -1.442695, %v498_v61  ;;  %v168_v63 = vadd.f32 %v2617_v44, %v2546_v25 }
 0x6e2   :  { %2271 = vpow2.f32 %v1973_v4 }
 0x6eb   :  { %v2270_v3 = vpop.eup %2269 }
 0x6ec   :  { %514 = vrot.lane.b32.xlu0 %v2270_v3, %s2402_s18  ;;  %v2272_v5 = vpop.eup %2271 }
 0x6ed   :  { %v505_v12 = vadd.f32 1.0, %v2272_v5 }
 0x6ef   :  { %2273 = vrcp.f32 %v505_v12 }
 0x6f9   :  { %v2274_v6 = vpop.eup %2273 }
 0x6fa   :  { %v512_v2 = vmul.f32 %v2274_v6, %v437_v39 }
 0x75e   :  { %v515_v0 = vpop.permute.xlu0 %514 }
 0x75f   :  { %v517_v8 = vmul.f32 %v2274_v6, %v515_v0 }
 0x761   :  { %519 = vrot.lane.b32.xlu1 %v517_v8, %s2402_s18 }
 0x7d3   :  { %v520_v10 = vpop.permute.xlu1 %519 }
 0x7d4   :  { %v522_v11 = vadd.f32 %v520_v10, %v512_v2 }
 0x7d6   :  { %2275 = vtanh.f32 %v522_v11 }
 0x7d7   :  { %2277 = vpow2.f32 %v1974_v14 }
 0x7e0   :  { %v2276_v13 = vpop.eup %2275 }
 0x7e1   :  { %525 = vrot.lane.b32.xlu0 %v2276_v13, %s2402_s18  ;;  %v2278_v16 = vpop.eup %2277 }
 0x7e2   :  { %v506_v23 = vadd.f32 1.0, %v2278_v16 }
 0x7e4   :  { %2279 = vrcp.f32 %v506_v23 }
 0x7ee   :  { %v2280_v24 = vpop.eup %2279 }
 0x853   :  { %v526_v26 = vpop.permute.xlu0 %525 }
 0x854   :  { %v2652_v27 = vmul.f32 %v2280_v24, %v526_v26  ;;  %v174_v26 = vadd.f32 %v2621_v46, %v2546_v25 }
 0x856   :  { %529 = vst.msk [vmem:[#allocation3 + $0x18] sm:$0xff] %vm228_vm2, %v2652_v27  ;;  %v537_v28 = vpack.c.bf16 %v2652_v27, %v2652_v27 }
 0x858   :  { %1975 = vmatmul.mubr.msk.bf16.vlgmr.msra.gmra.mrb[8].mxu1 %vm278_vm3, %v537_v28  ;;  %v176_v28 = vadd.f32 %v2623_v47, %v2480_v9 }
 0x859   :  { %712 = vmatpush1.bf16.msra.mxu1 %v2493_v15  ;;  %743 = vmatprep.mubr.bf16.mxu1 %v2401_v1 }
 0x85a   :  { %713 = vmatprep.subr.bf16.mxu1 %v2503_v17 }
 0x85d   :  { %714 = vmatpush1.bf16.msra.mxu1 %v2508_v18 }
 0x85e   :  { %715 = vmatprep.subr.bf16.mxu1 %v2514_v19 }
 0x861   :  { %716 = vmatpush1.bf16.msra.mxu1 %v2522_v20 }
 0x862   :  { %717 = vmatprep.subr.bf16.mxu1 %v2529_v21 }
 0x865   :  { %718 = vmatpush1.bf16.msra.mxu1 %v2536_v22 }
 0x92b   :  { %v575_v31 = vpop.f32.mrb[8].mxu1 }
 0x92c   :  { %v582_v32 = vadd.f32 %v575_v31, %v164_v29  ;;  %v577_v33 = vpop.f32.mrb[9].mxu1 }
 0x92d   :  { %v583_v34 = vadd.f32 %v577_v33, %v166_v30  ;;  %v579_v35 = vpop.f32.mrb[10].mxu1 }
 0x92e   :  { %v580_v36 = vpop.f32.mrb[11].mxu1  ;;  %v1976_v39 = vmul.f32 -1.442695, %v582_v32 }
 0x92f   :  { %2281 = vtanh.f32 %v583_v34  ;;  %v1977_v56 = vmul.f32 -1.442695, %v583_v34 }
 0x930   :  { %2283 = vpow2.f32 %v1976_v39 }
 0x939   :  { %v2282_v37 = vpop.eup %2281 }
 0x93a   :  { %599 = vrot.lane.b32.xlu1 %v2282_v37, %s2402_s18  ;;  %v2284_v40 = vpop.eup %2283 }
 0x93b   :  { %v590_v41 = vadd.f32 1.0, %v2284_v40 }
 0x93d   :  { %2285 = vrcp.f32 %v590_v41 }
 0x947   :  { %v2286_v50 = vpop.eup %2285 }
 0x948   :  { %v597_v43 = vmul.f32 %v2286_v50, %v522_v11 }
 0x9ac   :  { %v600_v42 = vpop.permute.xlu1 %599 }
 0x9ad   :  { %v602_v51 = vmul.f32 %v2286_v50, %v600_v42 }
 0x9af   :  { %604 = vrot.lane.b32.xlu0 %v602_v51, %s2402_s18 }
 0xa21   :  { %v605_v52 = vpop.permute.xlu0 %604 }
 0xa22   :  { %v607_v53 = vadd.f32 %v605_v52, %v597_v43 }
 0xa24   :  { %2287 = vtanh.f32 %v607_v53 }
 0xa25   :  { %2289 = vpow2.f32 %v1977_v56 }
 0xa2e   :  { %v2288_v55 = vpop.eup %2287 }
 0xa2f   :  { %610 = vrot.lane.b32.xlu1 %v2288_v55, %s2402_s18  ;;  %v2290_v57 = vpop.eup %2289 }
 0xa30   :  { %v591_v58 = vadd.f32 1.0, %v2290_v57 }
 0xa32   :  { %2291 = vrcp.f32 %v591_v58 }
 0xa3c   :  { %v2292_v59 = vpop.eup %2291 }
 0xaa1   :  { %v611_v60 = vpop.permute.xlu1 %610 }
 0xaa2   :  { %v2674_v61 = vmul.f32 %v2292_v59, %v611_v60  ;;  %v178_v59 = vadd.f32 %v2625_v48, %v2546_v25  ;;  %v180_v60 = vadd.f32 %v2627_v49, %v2480_v9 }
 0xaa4   :  { %614 = vst.msk [vmem:[#allocation3 + $0x20] sm:$0xff] %vm228_vm2, %v2674_v61  ;;  %v622_v62 = vpack.c.bf16 %v2674_v61, %v2674_v61 }
 0xaa6   :  { %1978 = vmatmul.mubr.msk.bf16.vlgmr.msra.gmra.mrb[20].mxu0 %vm278_vm3, %v622_v62 }
 0xaa7   :  { %797 = vmatpush1.bf16.msra.mxu0 %v2493_v15  ;;  %828 = vmatprep.mubr.bf16.mxu0 %v2401_v1  ;;  %v170_v15 = vadd.f32 %v2619_v45, %v2480_v9 }
 0xaa8   :  { %798 = vmatprep.subr.bf16.mxu0 %v2503_v17 }
 0xaab   :  { %799 = vmatpush1.bf16.msra.mxu0 %v2508_v18 }
 0xaac   :  { %800 = vmatprep.subr.bf16.mxu0 %v2514_v19 }
 0xaaf   :  { %801 = vmatpush1.bf16.msra.mxu0 %v2522_v20 }
 0xab0   :  { %802 = vmatprep.subr.bf16.mxu0 %v2529_v21 }
 0xab3   :  { %803 = vmatpush1.bf16.msra.mxu0 %v2536_v22 }
 0xb79   :  { %v660_v3 = vpop.f32.mrb[20].mxu0 }
 0xb7a   :  { %v667_v1 = vadd.f32 %v660_v3, %v168_v63  ;;  %v662_v4 = vpop.f32.mrb[21].mxu0 }
 0xb7b   :  { %v668_v17 = vadd.f32 %v662_v4, %v170_v15  ;;  %v664_v5 = vpop.f32.mrb[22].mxu0 }
 0xb7c   :  { %v665_v18 = vpop.f32.mrb[23].mxu0  ;;  %v1979_v20 = vmul.f32 -1.442695, %v667_v1 }
 0xb7d   :  { %2293 = vtanh.f32 %v668_v17  ;;  %v1980_v10 = vmul.f32 -1.442695, %v668_v17 }
 0xb7e   :  { %2295 = vpow2.f32 %v1979_v20 }
 0xb87   :  { %v2294_v19 = vpop.eup %2293 }
 0xb88   :  { %684 = vrot.lane.b32.xlu0 %v2294_v19, %s2402_s18  ;;  %v2296_v21 = vpop.eup %2295 }
 0xb89   :  { %v675_v22 = vadd.f32 1.0, %v2296_v21 }
 0xb8b   :  { %2297 = vrcp.f32 %v675_v22 }
 0xb95   :  { %v2298_v12 = vpop.eup %2297 }
 0xb96   :  { %v682_v45 = vmul.f32 %v2298_v12, %v607_v53 }
 0xbfa   :  { %v685_v44 = vpop.permute.xlu0 %684 }
 0xbfb   :  { %v687_v6 = vmul.f32 %v2298_v12, %v685_v44 }
 0xbfd   :  { %689 = vrot.lane.b32.xlu1 %v687_v6, %s2402_s18 }
 0xc6f   :  { %v690_v0 = vpop.permute.xlu1 %689 }
 0xc70   :  { %v692_v8 = vadd.f32 %v690_v0, %v682_v45  ;;  %v2219_v0 = vld [vmem:[%s2937_s4 + $0x10] sm:$0xff]  }
 0xc71   :  { %2077 = vmatprep.subr.bf16.mxu1 %v2219_v0 }
 0xc72   :  { %2299 = vtanh.f32 %v692_v8 }
 0xc73   :  { %2301 = vpow2.f32 %v1980_v10 }
 0xc7c   :  { %v2300_v2 = vpop.eup %2299 }
 0xc7d   :  { %695 = vrot.lane.b32.xlu0 %v2300_v2, %s2402_s18  ;;  %v2302_v11 = vpop.eup %2301 }
 0xc7e   :  { %v676_v13 = vadd.f32 1.0, %v2302_v11 }
 0xc80   :  { %2303 = vrcp.f32 %v676_v13  ;;  %v2221_v13 = vld [vmem:[%s2937_s4] sm:$0xff]  }
 0xc8a   :  { %v2304_v14 = vpop.eup %2303 }
 0xcef   :  { %v696_v16 = vpop.permute.xlu0 %695 }
 0xcf0   :  { %v2696_v23 = vmul.f32 %v2304_v14, %v696_v16  ;;  %v2222_v14 = vld [vmem:[%s2938_s7 + $0x10] sm:$0xff]   ;;  %v2404_v16 = vmov 0.0  }
 0xcf1   :  { %2101 = vmatprep.subr.bf16.mxu0 %v2404_v16 }
 0xcf2   :  { %699 = vst.msk [vmem:[#allocation3 + $0x28] sm:$0xff] %vm228_vm2, %v2696_v23  ;;  %v707_v24 = vpack.c.bf16 %v2696_v23, %v2696_v23 }
 0xcf4   :  { %1981 = vmatmul.mubr.msk.bf16.vlgmr.msra.gmra.mrb[12].mxu1 %vm278_vm3, %v707_v24  ;;  %v2224_v24 = vld [vmem:[%s2938_s7 + $0x18] sm:$0xff]  }
 0xcf5   :  { %2078 = vmatpush3.bf16.msra.mxu1 %v2219_v0 }
 0xdc7   :  { %v745_v29 = vpop.f32.mrb[12].mxu1 }
 0xdc8   :  { %v752_v30 = vadd.f32 %v745_v29, %v174_v26  ;;  %v747_v31 = vpop.f32.mrb[13].mxu1 }
 0xdc9   :  { %v753_v32 = vadd.f32 %v747_v31, %v176_v28  ;;  %v749_v33 = vpop.f32.mrb[14].mxu1 }
 0xdca   :  { %v750_v34 = vpop.f32.mrb[15].mxu1  ;;  %v1982_v36 = vmul.f32 -1.442695, %v752_v30 }
 0xdcb   :  { %2305 = vtanh.f32 %v753_v32  ;;  %v1983_v43 = vmul.f32 -1.442695, %v753_v32  ;;  %v2223_v34 = vld [vmem:[%s2937_s4 + $0x8] sm:$0xff]  }
 0xdcc   :  { %2307 = vpow2.f32 %v1982_v36 }
 0xdd5   :  { %v2306_v35 = vpop.eup %2305 }
 0xdd6   :  { %769 = vrot.lane.b32.xlu1 %v2306_v35, %s2402_s18  ;;  %v2308_v37 = vpop.eup %2307 }
 0xdd7   :  { %v760_v39 = vadd.f32 1.0, %v2308_v37 }
 0xdd9   :  { %2309 = vrcp.f32 %v760_v39  ;;  %v876_v39 = vld [vmem:[#allocation3 + $0x8] sm:$0xff] }
 0xde3   :  { %v2310_v40 = vpop.eup %2309 }
 0xde4   :  { %v767_v47 = vmul.f32 %v2310_v40, %v692_v8  ;;  %v2220_v8 = vld [vmem:[%s2937_s4 + $0x18] sm:$0xff]  }
 0xde5   :  { %2079 = vmatprep.subr.bf16.mxu1 %v2220_v8 }
 0xde6   :  { %2080 = vmatpush3.bf16.msra.mxu1 %v2220_v8 }
 0xde7   :  { %2089 = vmatprep.subr.bf16.mxu1 %v2221_v13 }
 0xe48   :  { %v770_v46 = vpop.permute.xlu1 %769 }
 0xe49   :  { %v772_v41 = vmul.f32 %v2310_v40, %v770_v46 }
 0xe4b   :  { %774 = vrot.lane.b32.xlu0 %v772_v41, %s2402_s18 }
 0xebd   :  { %v775_v50 = vpop.permute.xlu0 %774 }
 0xebe   :  { %v777_v42 = vadd.f32 %v775_v50, %v767_v47  ;;  %v875_v47 = vld [vmem:[#allocation3] sm:$0xff] }
 0xebf   :  { %v883_v50 = vpack.c.bf16 %v876_v39, %v875_v47 }
 0xec0   :  { %2311 = vtanh.f32 %v777_v42 }
 0xec1   :  { %2313 = vpow2.f32 %v1983_v43 }
 0xeca   :  { %v2312_v51 = vpop.eup %2311 }
 0xecb   :  { %780 = vrot.lane.b32.xlu1 %v2312_v51, %s2402_s18  ;;  %v2314_v52 = vpop.eup %2313 }
 0xecc   :  { %v761_v53 = vadd.f32 1.0, %v2314_v52  ;;  %v2226_v52 = vld [vmem:[%s2938_s7 + $0x8] sm:$0xff]  }
 0xece   :  { %2315 = vrcp.f32 %v761_v53  ;;  %v878_v53 = vld [vmem:[#allocation3 + $0x18] sm:$0xff] }
 0xed8   :  { %v2316_v55 = vpop.eup %2315 }
 0xf3d   :  { %v781_v56 = vpop.permute.xlu1 %780 }
 0xf3e   :  { %v783_v57 = vmul.f32 %v2316_v55, %v781_v56  ;;  %v880_v56 = vld [vmem:[#allocation3 + $0x28] sm:$0xff] }
 0xf40   :  { %784 = vst.msk [vmem:[#allocation3 + $0x30] sm:$0xff] %vm228_vm2, %v783_v57  ;;  %v792_v58 = vpack.c.bf16 %v783_v57, %v783_v57 }
 0xf42   :  { %1984 = vmatmul.mubr.msk.bf16.vlgmr.msra.gmra.mrb[24].mxu0 %vm278_vm3, %v792_v58  ;;  %v877_v58 = vld [vmem:[#allocation3 + $0x10] sm:$0xff] }
 0xf43   :  { %2102 = vmatpush3.bf16.msra.mxu0 %v2222_v14  ;;  %2105 = vmatprep.mubr.msk.bf16.mxu0 %vm2405_vm4, %v2404_v16 }
 0xf44   :  { %2103 = vmatprep.subr.bf16.mxu0 %v2404_v16 }
 0xf47   :  { %2104 = vmatpush3.bf16.msra.mxu0 %v2224_v24  ;;  %v881_v55 = vld [vmem:[#allocation3 + $0x30] sm:$0xff] }
 0xf48   :  { %2109 = vmatprep.subr.bf16.mxu0 %v2404_v16 }
0x1015   :  { %v830_v62 = vpop.f32.mrb[24].mxu0 }
0x1016   :  { %v837_v63 = vadd.f32 %v830_v62, %v178_v59  ;;  %v832_v15 = vpop.f32.mrb[25].mxu0  ;;  %v884_v59 = vpack.c.bf16 %v878_v53, %v877_v58 }
0x1017   :  { %v838_v3 = vadd.f32 %v832_v15, %v180_v60  ;;  %v834_v1 = vpop.f32.mrb[26].mxu0  ;;  %v879_v60 = vld [vmem:[#allocation3 + $0x20] sm:$0xff] }
0x1018   :  { %v835_v4 = vpop.f32.mrb[27].mxu0  ;;  %v1985_v5 = vmul.f32 -1.442695, %v837_v63  ;;  %v885_v62 = vpack.c.bf16 %v880_v56, %v879_v60 }
0x1019   :  { %2317 = vtanh.f32 %v838_v3 }
0x101a   :  { %2319 = vpow2.f32 %v1985_v5 }
0x1023   :  { %v2318_v17 = vpop.eup %2317 }
0x1024   :  { %854 = vrot.lane.b32.xlu0 %v2318_v17, %s2402_s18  ;;  %v2320_v18 = vpop.eup %2319  ;;  %v1999_v17 = vld [vmem:[%s2939_s5] ss:$0 sm:$0xff]  ;;  %s2406_s5 = smov 32  }
0x1025   :  { %v845_v19 = vadd.f32 1.0, %v2320_v18 }
0x1027   :  { %2321 = vrcp.f32 %v845_v19 }
0x1031   :  { %v2322_v20 = vpop.eup %2321 }
0x1032   :  { %v852_v9 = vmul.f32 %v2322_v20, %v777_v42  ;;  %v2225_v42 = vld [vmem:[%s2938_s7] sm:$0xff]  }
0x1096   :  { %v855_v25 = vpop.permute.xlu0 %854 }
0x1097   :  { %v857_v48 = vmul.f32 %v2322_v20, %v855_v25 }
0x1099   :  { %859 = vrot.lane.b32.xlu1 %v857_v48, %s2402_s18 }
0x109d   :  { %786 = vrot.lane.b32.xlu1 %v783_v57, %s2403_s0 }
0x10a1   :  { %616 = vrot.lane.b32.xlu1 %v2674_v61, %s2403_s0 }
0x10a5   :  { %446 = vrot.lane.b32.xlu1 %v2629_v54, %s2403_s0 }
0x10a9   :  { %231 = vrot.lane.b32.xlu1 %v2550_v38, %s2403_s0  ;;  %v1986_v38 = vmul.f32 -1.442695, %v838_v3 }
0x110b   :  { %v860_v49 = vpop.permute.xlu1 %859 }
0x110c   :  { %v862_v21 = vadd.f32 %v860_v49, %v852_v9 }
0x110e   :  { %2323 = vtanh.f32 %v862_v21 }
0x110f   :  { %v787_v22 = vpop.permute.xlu1 %786  ;;  %2325 = vpow2.f32 %v1986_v38 }
0x1110   :  { %789 = vst.msk [vmem:[#allocation4 + $0x8] sm:$0xff] %vm228_vm2, %v787_v22 }
0x1113   :  { %v617_v12 = vpop.permute.xlu1 %616 }
0x1114   :  { %619 = vst.msk [vmem:[#allocation4 + $0x18] sm:$0xff] %vm228_vm2, %v617_v12 }
0x1117   :  { %v447_v44 = vpop.permute.xlu1 %446  ;;  %v888_v30 = vld [vmem:[#allocation4 + $0x8] sm:$0xff] }
0x1118   :  { %v2324_v6 = vpop.eup %2323  ;;  %449 = vst.msk [vmem:[#allocation4 + $0x28] sm:$0xff] %vm228_vm2, %v447_v44 }
0x1119   :  { %865 = vrot.lane.b32.xlu0 %v2324_v6, %s2402_s18  ;;  %v2326_v61 = vpop.eup %2325 }
0x111a   :  { %v846_v45 = vadd.f32 1.0, %v2326_v61 }
0x111b   :  { %v232_v54 = vpop.permute.xlu1 %231  ;;  %v890_v33 = vld [vmem:[#allocation4 + $0x18] sm:$0xff] }
0x111c   :  { %234 = vst.msk [vmem:[#allocation4 + $0x38] sm:$0xff] %vm228_vm2, %v232_v54  ;;  %2327 = vrcp.f32 %v846_v45 }
0x111f   :  { %v892_v36 = vld [vmem:[#allocation4 + $0x28] sm:$0xff] }
0x1123   :  { %v894_v46 = vld [vmem:[#allocation4 + $0x38] sm:$0xff] }
0x1126   :  { %v2328_v2 = vpop.eup %2327 }
0x118b   :  { %v866_v10 = vpop.permute.xlu0 %865 }
0x118c   :  { %v868_v11 = vmul.f32 %v2328_v2, %v866_v10 }
0x118e   :  { %869 = vst.msk [vmem:[#allocation3 + $0x38] sm:$0xff] %vm228_vm2, %v868_v11  ;;  %871 = vrot.lane.b32.xlu0 %v868_v11, %s2403_s0 }
0x1192   :  { %701 = vrot.lane.b32.xlu0 %v2696_v23, %s2403_s0 }
0x1195   :  { %v882_v43 = vld [vmem:[#allocation3 + $0x38] sm:$0xff] }
0x1196   :  { %531 = vrot.lane.b32.xlu0 %v2652_v27, %s2403_s0  ;;  %v886_v57 = vpack.c.bf16 %v882_v43, %v881_v55 }
0x1198   :  { %v1174_v63 = vrot.slane %v886_v57, 4 }
0x119a   :  { %361 = vrot.lane.b32.xlu0 %v2582_v7, %s2403_s0 }
0x1200   :  { %v872_v23 = vpop.permute.xlu0 %871 }
0x1201   :  { %874 = vst.msk [vmem:[#allocation4] sm:$0xff] %vm228_vm2, %v872_v23 }
0x1204   :  { %v702_v26 = vpop.permute.xlu0 %701 }
0x1205   :  { %704 = vst.msk [vmem:[#allocation4 + $0x10] sm:$0xff] %vm228_vm2, %v702_v26 }
0x1208   :  { %v532_v28 = vpop.permute.xlu0 %531  ;;  %v887_v29 = vld [vmem:[#allocation4] sm:$0xff] }
0x1209   :  { %534 = vst.msk [vmem:[#allocation4 + $0x20] sm:$0xff] %vm228_vm2, %v532_v28  ;;  %v895_v27 = vpack.c.bf16 %v888_v30, %v887_v29  ;;  %v2811_v29 = vld [vmem:[%s2940_s6] sm:$0xff]   ;;  %v2817_v30 = vld [vmem:[%s2940_s6 + $0x8] sm:$0xff]  }
0x120b   :  { %2081 = vmatprep.mubr.msk.bf16.mxu1 %vm228_vm2, %v895_v27 }
0x120c   :  { %v362_v31 = vpop.permute.xlu0 %361  ;;  %v889_v32 = vld [vmem:[#allocation4 + $0x10] sm:$0xff] }
0x120d   :  { %364 = vst.msk [vmem:[#allocation4 + $0x30] sm:$0xff] %vm228_vm2, %v362_v31  ;;  %v896_v7 = vpack.c.bf16 %v890_v33, %v889_v32 }
0x120f   :  { %2082 = vmatmul.mubr.msk.bf16.vlgmr.msra.gmra.mrb[16].mxu1 %vm228_vm2, %v896_v7 }
0x1210   :  { %2090 = vmatpush3.bf16.msra.mxu1 %v2221_v13  ;;  %v891_v35 = vld [vmem:[#allocation4 + $0x20] sm:$0xff] }
0x1211   :  { %v897_v37 = vpack.c.bf16 %v892_v36, %v891_v35  ;;  %2091 = vmatprep.subr.bf16.mxu1 %v2223_v34 }
0x1213   :  { %2085 = vmatprep.mubr.msk.bf16.mxu1 %vm228_vm2, %v897_v37 }
0x1214   :  { %v893_v40 = vld [vmem:[#allocation4 + $0x30] sm:$0xff]  ;;  %2092 = vmatpush3.bf16.msra.mxu1 %v2223_v34 }
0x1215   :  { %v898_v41 = vpack.c.bf16 %v894_v46, %v893_v40  ;;  %2133 = vmatprep.subr.bf16.mxu1 %v2404_v16 }
0x1217   :  { %2086 = vmatmul.mubr.msk.bf16.gmra.mrb[20].mxu1 %vm228_vm2, %v898_v41  ;;  %v1117_v51 = vrot.slane %v898_v41, 4 }
0x1218   :  { %2093 = vmatprep.mubr.msk.bf16.mxu1 %vm228_vm2, %v883_v50 }
0x1219   :  { %2106 = vmatmul.mubr.msk.bf16.vlgmr.msra.gmra.mrb[28].mxu0 %vm228_vm2, %v1117_v51 }
0x121a   :  { %2110 = vmatpush3.bf16.msra.mxu0 %v2225_v42  ;;  %2113 = vmatprep.mubr.msk.bf16.mxu0 %vm2405_vm4, %v2404_v16 }
0x121b   :  { %2111 = vmatprep.subr.bf16.mxu0 %v2404_v16 }
0x121e   :  { %2112 = vmatpush3.bf16.msra.mxu0 %v2226_v52 }
0x121f   :  { %2094 = vmatmul.mubr.msk.bf16.vlgmr.msra.gmra.mrb[16].mxu1 %vm228_vm2, %v884_v59  ;;  %2117 = vmatprep.subr.bf16.mxu0 %v2404_v16 }
0x1220   :  { %2097 = vmatprep.mubr.msk.bf16.mxu1 %vm228_vm2, %v885_v62  ;;  %2134 = vmatpush3.bf16.msra.mxu1 %v2811_v29 }
0x1221   :  { %2114 = vmatmul.mubr.msk.bf16.vlgmr.msra.gmra.mrb[32].mxu0 %vm228_vm2, %v1174_v63  ;;  %2135 = vmatprep.subr.bf16.mxu1 %v2404_v16 }
0x1222   :  { %2121 = vmatprep.mubr.msk.bf16.mxu0 %vm2405_vm4, %v2404_v16  ;;  %2118 = vmatpush3.bf16.msra.mxu0 %v2811_v29 }
0x1223   :  { %2119 = vmatprep.subr.bf16.mxu0 %v2404_v16 }
0x1224   :  { %2136 = vmatpush3.bf16.msra.mxu1 %v2817_v30 }
0x1225   :  { %2149 = vmatprep.subr.bf16.mxu1 %v2404_v16 }
0x1226   :  { %2120 = vmatpush3.bf16.msra.mxu0 %v2817_v30 }
0x1227   :  { %2098 = vmatmul.mubr.msk.bf16.gmra.mrb[20].mxu1 %vm228_vm2, %v886_v57  ;;  %2125 = vmatprep.subr.bf16.mxu0 %v2404_v16 }
0x1228   :  { %2137 = vmatprep.mubr.msk.bf16.mxu1 %vm2405_vm4, %v2404_v16 }
0x12ec   :  { %v1167_v15 = vpop.f32.mrb[28].mxu0 }
0x12ed   :  { %v2107_v3 = vpop.f32.mrb[29].mxu0 }
0x12ee   :  { %v1170_v1 = vpop.f32.mrb[30].mxu0 }
0x12ef   :  { %v2108_v4 = vpop.f32.mrb[31].mxu0 }
0x12f2   :  { %v2095_v5 = vpop.f32.mrb[16].mxu1 }
0x12f3   :  { %v2793_v18 = vadd.f32 %v2095_v5, %v1999_v17  ;;  %v1054_v19 = vpop.f32.mrb[17].mxu1 }
0x12f4   :  { %v1092_v20 = vadd.f32 %v1999_v17, %v1054_v19  ;;  %v2096_v25 = vpop.f32.mrb[18].mxu1  ;;  %v1224_v48 = vpop.f32.mrb[32].mxu0 }
0x12f5   :  { %v2795_v9 = vadd.f32 %v2096_v25, %v1999_v17  ;;  %v2797_v49 = vadd.f32 %v1224_v48, %v1167_v15  ;;  %v1057_v21 = vpop.f32.mrb[19].mxu1  ;;  %v2115_v22 = vpop.f32.mrb[33].mxu0 }
0x12f6   :  { %2329 = vtanh.f32 %v1092_v20  ;;  %v1093_v12 = vadd.f32 %v1999_v17, %v1057_v21  ;;  %v1227_v44 = vpop.f32.mrb[34].mxu0  ;;  %v2007_v13 = vmul.f32 -1.442695, %v1092_v20 }
0x12f7   :  { %v2116_v6 = vpop.f32.mrb[35].mxu0 }
0x12f8   :  { %2331 = vpow2.f32 %v2007_v13 }
0x12fa   :  { %v2099_v54 = vpop.f32.mrb[20].mxu1 }
0x12fb   :  { %v2799_v38 = vadd.f32 %v2099_v54, %v1999_v17  ;;  %v1070_v61 = vpop.f32.mrb[21].mxu1 }
0x12fc   :  { %v2801_v45 = vadd.f32 %v1999_v17, %v1070_v61  ;;  %v2100_v0 = vpop.f32.mrb[22].mxu1 }
0x12fd   :  { %v2803_v8 = vadd.f32 %v2100_v0, %v1999_v17  ;;  %v1073_v2 = vpop.f32.mrb[23].mxu1 }
0x12fe   :  { %v2805_v10 = vadd.f32 %v1999_v17, %v1073_v2 }
0x1300   :  { %v2330_v11 = vpop.eup %2329 }
0x1301   :  { %1255 = vrot.lane.b32.xlu1 %v2330_v11, %s2406_s5 }
0x1302   :  { %v2332_v14 = vpop.eup %2331 }
0x1303   :  { %v1245_v24 = vadd.f32 1.0, %v2332_v14 }
0x1305   :  { %2333 = vrcp.f32 %v1245_v24 }
0x130f   :  { %v2334_v23 = vpop.eup %2333 }
0x1373   :  { %v1256_v26 = vpop.permute.xlu1 %1255 }
0x1374   :  { %v1261_v28 = vmul.f32 %v2334_v23, %v1256_v26 }
0x1376   :  { %2335 = vtanh.f32 %v1261_v28 }
0x1380   :  { %v2336_v27 = vpop.eup %2335 }
0x1381   :  { %1267 = vrot.lane.b32.xlu0 %v2336_v27, %s2402_s18 }
0x13f3   :  { %v1268_v31 = vpop.permute.xlu0 %1267 }
0x13f4   :  { %v1273_v32 = vmul.f32 %v2334_v23, %v1268_v31 }
0x13f6   :  { %v1280_v33 = vpack.c.bf16 %v1273_v32, %v1273_v32 }
0x13f8   :  { %1282 = vrot.lane.b32.xlu1 %v1280_v33, %s2402_s18 }
0x13fc   :  { %1348 = vrot.lane.b32.xlu1 %v1261_v28, %s2406_s5 }
0x146a   :  { %v1283_v7 = vpop.permute.xlu1 %1282 }
0x146b   :  { %2122 = vmatmul.mubr.msk.bf16.vlgmr.msra.gmra.mrb[36].mxu0 %vm228_vm2, %v1283_v7 }
0x146c   :  { %2126 = vmatpush3.bf16.msra.mxu0 %v2811_v29  ;;  %2129 = vmatprep.mubr.msk.bf16.mxu0 %vm2405_vm4, %v2404_v16 }
0x146d   :  { %2127 = vmatprep.subr.bf16.mxu0 %v2404_v16 }
0x146e   :  { %v1349_v43 = vpop.permute.xlu1 %1348 }
0x1470   :  { %2128 = vmatpush3.bf16.msra.mxu0 %v2817_v30 }
0x1471   :  { %2141 = vmatprep.subr.bf16.mxu0 %v2404_v16 }
0x153e   :  { %v1333_v34 = vpop.f32.mrb[36].mxu0 }
0x153f   :  { %v1339_v35 = vadd.f32 %v1333_v34, %v1093_v12  ;;  %v2123_v36 = vpop.f32.mrb[37].mxu0 }
0x1540   :  { %v1336_v37 = vpop.f32.mrb[38].mxu0 }
0x1541   :  { %2337 = vtanh.f32 %v1339_v35  ;;  %v2124_v39 = vpop.f32.mrb[39].mxu0  ;;  %v2012_v46 = vmul.f32 -1.442695, %v1339_v35 }
0x1543   :  { %2339 = vpow2.f32 %v2012_v46 }
0x154b   :  { %v2338_v40 = vpop.eup %2337 }
0x154c   :  { %1353 = vrot.lane.b32.xlu0 %v2338_v40, %s2406_s5 }
0x154d   :  { %v2340_v41 = vpop.eup %2339 }
0x154e   :  { %v1343_v47 = vadd.f32 1.0, %v2340_v41 }
0x1550   :  { %2341 = vrcp.f32 %v1343_v47 }
0x155a   :  { %v2342_v50 = vpop.eup %2341 }
0x155b   :  { %v1351_v52 = vmul.f32 %v2342_v50, %v1349_v43 }
0x15be   :  { %v1354_v42 = vpop.permute.xlu0 %1353 }
0x15bf   :  { %v1356_v51 = vmul.f32 %v2342_v50, %v1354_v42 }
0x15c1   :  { %1358 = vrot.lane.b32.xlu0 %v1356_v51, %s2406_s5 }
0x1633   :  { %v1359_v53 = vpop.permute.xlu0 %1358 }
0x1634   :  { %v1361_v55 = vadd.f32 %v1359_v53, %v1351_v52 }
0x1636   :  { %2343 = vtanh.f32 %v1361_v55 }
0x1640   :  { %v2344_v56 = vpop.eup %2343 }
0x1641   :  { %1364 = vrot.lane.b32.xlu1 %v2344_v56, %s2406_s5 }
0x16b3   :  { %v1365_v57 = vpop.permute.xlu1 %1364 }
0x16b4   :  { %v1367_v58 = vmul.f32 %v2342_v50, %v1365_v57 }
0x16b6   :  { %v1369_v59 = vpack.c.bf16 %v1367_v58, %v1367_v58 }
0x16b8   :  { %1371 = vrot.lane.b32.xlu0 %v1369_v59, %s2402_s18 }
0x172a   :  { %v1372_v60 = vpop.permute.xlu0 %1371 }
0x172b   :  { %2130 = vmatmul.mubr.msk.bf16.vlgmr.msra.gmra.mrb[40].mxu0 %vm228_vm2, %v1372_v60 }
0x172c   :  { %2142 = vmatpush3.bf16.msra.mxu0 %v2811_v29  ;;  %2145 = vmatprep.mubr.msk.bf16.mxu0 %vm2405_vm4, %v2404_v16 }
0x172d   :  { %2143 = vmatprep.subr.bf16.mxu0 %v2404_v16 }
0x1730   :  { %2144 = vmatpush3.bf16.msra.mxu0 %v2817_v30 }
0x1731   :  { %2157 = vmatprep.subr.bf16.mxu0 %v2404_v16 }
0x17fe   :  { %v1410_v62 = vpop.f32.mrb[40].mxu0 }
0x17ff   :  { %v1416_v63 = vadd.f32 %v1410_v62, %v2793_v18  ;;  %v2131_v15 = vpop.f32.mrb[41].mxu0 }
0x1800   :  { %v1413_v3 = vpop.f32.mrb[42].mxu0 }
0x1801   :  { %2345 = vtanh.f32 %v1416_v63  ;;  %v2132_v1 = vpop.f32.mrb[43].mxu0  ;;  %v2014_v17 = vmul.f32 -1.442695, %v1416_v63 }
0x1803   :  { %2347 = vpow2.f32 %v2014_v17 }
0x180b   :  { %v2346_v4 = vpop.eup %2345 }
0x180c   :  { %1426 = vrot.lane.b32.xlu1 %v2346_v4, %s2406_s5 }
0x180d   :  { %v2348_v5 = vpop.eup %2347 }
0x180e   :  { %v1420_v19 = vadd.f32 1.0, %v2348_v5 }
0x1810   :  { %2349 = vrcp.f32 %v1420_v19 }
0x181a   :  { %v2350_v20 = vpop.eup %2349 }
0x181b   :  { %v1424_v21 = vmul.f32 %v2350_v20, %v1361_v55 }
0x187e   :  { %v1427_v25 = vpop.permute.xlu1 %1426 }
0x187f   :  { %v1429_v48 = vmul.f32 %v2350_v20, %v1427_v25 }
0x1881   :  { %1431 = vrot.lane.b32.xlu0 %v1429_v48, %s2406_s5 }
0x18f3   :  { %v1432_v22 = vpop.permute.xlu0 %1431 }
0x18f4   :  { %v1434_v18 = vadd.f32 %v1432_v22, %v1424_v21 }
0x18f6   :  { %2351 = vtanh.f32 %v1434_v18 }
0x1900   :  { %v2352_v12 = vpop.eup %2351 }
0x1901   :  { %1437 = vrot.lane.b32.xlu1 %v2352_v12, %s2406_s5 }
0x1973   :  { %v1438_v44 = vpop.permute.xlu1 %1437 }
0x1974   :  { %v1440_v6 = vmul.f32 %v2350_v20, %v1438_v44 }
0x1976   :  { %v1442_v54 = vpack.c.bf16 %v1440_v6, %v1440_v6 }
0x1978   :  { %1444 = vrot.lane.b32.xlu0 %v1442_v54, %s2402_s18 }
0x19ea   :  { %v1445_v61 = vpop.permute.xlu0 %1444 }
0x19eb   :  { %2138 = vmatmul.mubr.msk.bf16.vlgmr.msra.gmra.mrb[24].mxu1 %vm228_vm2, %v1445_v61 }
0x19ec   :  { %2150 = vmatpush3.bf16.msra.mxu1 %v2811_v29  ;;  %2153 = vmatprep.mubr.msk.bf16.mxu1 %vm2405_vm4, %v2404_v16 }
0x19ed   :  { %2151 = vmatprep.subr.bf16.mxu1 %v2404_v16 }
0x19f0   :  { %2152 = vmatpush3.bf16.msra.mxu1 %v2817_v30 }
0x19f1   :  { %2165 = vmatprep.subr.bf16.mxu1 %v2404_v16 }
0x1abe   :  { %v1483_v0 = vpop.f32.mrb[24].mxu1 }
0x1abf   :  { %v1489_v2 = vadd.f32 %v1483_v0, %v2795_v9  ;;  %v2139_v11 = vpop.f32.mrb[25].mxu1 }
0x1ac0   :  { %v1486_v13 = vpop.f32.mrb[26].mxu1 }
0x1ac1   :  { %2353 = vtanh.f32 %v1489_v2  ;;  %v2140_v14 = vpop.f32.mrb[27].mxu1  ;;  %v2016_v23 = vmul.f32 -1.442695, %v1489_v2 }
0x1ac3   :  { %2355 = vpow2.f32 %v2016_v23 }
0x1acb   :  { %v2354_v24 = vpop.eup %2353 }
0x1acc   :  { %1499 = vrot.lane.b32.xlu1 %v2354_v24, %s2406_s5 }
0x1acd   :  { %v2356_v26 = vpop.eup %2355 }
0x1ace   :  { %v1493_v28 = vadd.f32 1.0, %v2356_v26 }
0x1ad0   :  { %2357 = vrcp.f32 %v1493_v28 }
0x1ada   :  { %v2358_v27 = vpop.eup %2357 }
0x1adb   :  { %v1497_v33 = vmul.f32 %v2358_v27, %v1434_v18 }
0x1b3e   :  { %v1500_v31 = vpop.permute.xlu1 %1499 }
0x1b3f   :  { %v1502_v32 = vmul.f32 %v2358_v27, %v1500_v31 }
0x1b41   :  { %1504 = vrot.lane.b32.xlu0 %v1502_v32, %s2406_s5 }
0x1bb3   :  { %v1505_v7 = vpop.permute.xlu0 %1504 }
0x1bb4   :  { %v1507_v9 = vadd.f32 %v1505_v7, %v1497_v33 }
0x1bb6   :  { %2359 = vtanh.f32 %v1507_v9 }
0x1bc0   :  { %v2360_v34 = vpop.eup %2359 }
0x1bc1   :  { %1510 = vrot.lane.b32.xlu1 %v2360_v34, %s2406_s5  ;;  %v2006_v34 = vld [vmem:[%s2941_s8] ss:$0 sm:$0xff] }
0x1c33   :  { %v1511_v35 = vpop.permute.xlu1 %1510 }
0x1c34   :  { %v1513_v36 = vmul.f32 %v2358_v27, %v1511_v35  ;;  %v1237_v35 = vadd.f32 %v2006_v34, %v2797_v49 }
0x1c36   :  { %v1515_v37 = vpack.c.bf16 %v1513_v36, %v1513_v36 }
0x1c38   :  { %1517 = vrot.lane.b32.xlu0 %v1515_v37, %s2402_s18 }
0x1caa   :  { %v1518_v39 = vpop.permute.xlu0 %1517 }
0x1cab   :  { %2146 = vmatmul.mubr.msk.bf16.vlgmr.msra.gmra.mrb[44].mxu0 %vm228_vm2, %v1518_v39 }
0x1cac   :  { %2158 = vmatpush3.bf16.msra.mxu0 %v2811_v29  ;;  %2161 = vmatprep.mubr.msk.bf16.mxu0 %vm2405_vm4, %v2404_v16 }
0x1cad   :  { %2159 = vmatprep.subr.bf16.mxu0 %v2404_v16 }
0x1cb0   :  { %2160 = vmatpush3.bf16.msra.mxu0 %v2817_v30 }
0x1cb1   :  { %2173 = vmatprep.subr.bf16.mxu0 %v2404_v16 }
0x1d7e   :  { %v1556_v40 = vpop.f32.mrb[44].mxu0 }
0x1d7f   :  { %v1562_v46 = vadd.f32 %v1556_v40, %v2801_v45  ;;  %v2147_v41 = vpop.f32.mrb[45].mxu0 }
0x1d80   :  { %v1559_v47 = vpop.f32.mrb[46].mxu0 }
0x1d81   :  { %2361 = vtanh.f32 %v1562_v46  ;;  %v2148_v50 = vpop.f32.mrb[47].mxu0  ;;  %v2018_v51 = vmul.f32 -1.442695, %v1562_v46  ;;  %v2008_v46 = vmul.f32 -1.442695, %v1237_v35 }
0x1d83   :  { %2363 = vpow2.f32 %v2018_v51 }
0x1d8b   :  { %v2362_v42 = vpop.eup %2361 }
0x1d8c   :  { %1572 = vrot.lane.b32.xlu1 %v2362_v42, %s2406_s5 }
0x1d8d   :  { %v2364_v43 = vpop.eup %2363 }
0x1d8e   :  { %v1566_v52 = vadd.f32 1.0, %v2364_v43 }
0x1d90   :  { %2365 = vrcp.f32 %v1566_v52  ;;  %v2229_v52 = vld [vmem:[%s2942_s9 + $0x10] sm:$0xff]  }
0x1d9a   :  { %v2366_v53 = vpop.eup %2365 }
0x1d9b   :  { %v1570_v57 = vmul.f32 %v2366_v53, %v1507_v9 }
0x1dfe   :  { %v1573_v55 = vpop.permute.xlu1 %1572 }
0x1dff   :  { %v1575_v56 = vmul.f32 %v2366_v53, %v1573_v55 }
0x1e01   :  { %1577 = vrot.lane.b32.xlu0 %v1575_v56, %s2406_s5 }
0x1e73   :  { %v1578_v58 = vpop.permute.xlu0 %1577 }
0x1e74   :  { %v1580_v45 = vadd.f32 %v1578_v58, %v1570_v57 }
0x1e76   :  { %2367 = vtanh.f32 %v1580_v45 }
0x1e80   :  { %v2368_v59 = vpop.eup %2367 }
0x1e81   :  { %1583 = vrot.lane.b32.xlu1 %v2368_v59, %s2406_s5 }
0x1ef3   :  { %v1584_v60 = vpop.permute.xlu1 %1583 }
0x1ef4   :  { %v1586_v62 = vmul.f32 %v2366_v53, %v1584_v60  ;;  %v2230_v53 = vld [vmem:[%s2942_s9 + $0x18] sm:$0xff]  }
0x1ef6   :  { %v1588_v63 = vpack.c.bf16 %v1586_v62, %v1586_v62 }
0x1ef8   :  { %1590 = vrot.lane.b32.xlu0 %v1588_v63, %s2402_s18 }
0x1f6a   :  { %v1591_v15 = vpop.permute.xlu0 %1590 }
0x1f6b   :  { %2154 = vmatmul.mubr.msk.bf16.vlgmr.msra.gmra.mrb[28].mxu1 %vm228_vm2, %v1591_v15 }
0x1f6c   :  { %2166 = vmatpush3.bf16.msra.mxu1 %v2811_v29  ;;  %2169 = vmatprep.mubr.msk.bf16.mxu1 %vm2405_vm4, %v2404_v16 }
0x1f6d   :  { %2167 = vmatprep.subr.bf16.mxu1 %v2404_v16 }
0x1f70   :  { %2168 = vmatpush3.bf16.msra.mxu1 %v2817_v30 }
0x1f71   :  { %2181 = vmatprep.subr.bf16.mxu1 %v2404_v16 }
0x203e   :  { %v1629_v3 = vpop.f32.mrb[28].mxu1 }
0x203f   :  { %v1635_v1 = vadd.f32 %v1629_v3, %v2805_v10  ;;  %v2155_v4 = vpop.f32.mrb[29].mxu1 }
0x2040   :  { %v1632_v17 = vpop.f32.mrb[30].mxu1 }
0x2041   :  { %2369 = vtanh.f32 %v1635_v1  ;;  %v2156_v5 = vpop.f32.mrb[31].mxu1  ;;  %v2020_v29 = vmul.f32 -1.442695, %v1635_v1 }
0x2043   :  { %2371 = vpow2.f32 %v2020_v29 }
0x204b   :  { %v2370_v19 = vpop.eup %2369 }
0x204c   :  { %1645 = vrot.lane.b32.xlu1 %v2370_v19, %s2406_s5 }
0x204d   :  { %v2372_v20 = vpop.eup %2371 }
0x204e   :  { %v1639_v25 = vadd.f32 1.0, %v2372_v20 }
0x2050   :  { %2373 = vrcp.f32 %v1639_v25  ;;  %v2231_v25 = vld [vmem:[%s2942_s9] sm:$0xff]  }
0x205a   :  { %v2374_v48 = vpop.eup %2373 }
0x205b   :  { %v1643_v22 = vmul.f32 %v2374_v48, %v1580_v45 }
0x20be   :  { %v1646_v21 = vpop.permute.xlu1 %1645 }
0x20bf   :  { %v1648_v30 = vmul.f32 %v2374_v48, %v1646_v21 }
0x20c1   :  { %1650 = vrot.lane.b32.xlu0 %v1648_v30, %s2406_s5  ;;  %v2232_v30 = vld [vmem:[%s2942_s9 + $0x8] sm:$0xff]  }
0x2133   :  { %v1651_v18 = vpop.permute.xlu0 %1650 }
0x2134   :  { %v1653_v10 = vadd.f32 %v1651_v18, %v1643_v22 }
0x2136   :  { %2375 = vtanh.f32 %v1653_v10 }
0x2140   :  { %v2376_v12 = vpop.eup %2375 }
0x2141   :  { %1656 = vrot.lane.b32.xlu1 %v2376_v12, %s2406_s5 }
0x21b3   :  { %v1657_v44 = vpop.permute.xlu1 %1656 }
0x21b4   :  { %v1659_v6 = vmul.f32 %v2374_v48, %v1657_v44 }
0x21b6   :  { %v1661_v54 = vpack.c.bf16 %v1659_v6, %v1659_v6 }
0x21b8   :  { %1663 = vrot.lane.b32.xlu0 %v1661_v54, %s2402_s18 }
0x222a   :  { %v1664_v61 = vpop.permute.xlu0 %1663 }
0x222b   :  { %2162 = vmatmul.mubr.msk.bf16.vlgmr.msra.gmra.mrb[48].mxu0 %vm228_vm2, %v1664_v61 }
0x222c   :  { %2177 = vmatprep.mubr.msk.bf16.mxu0 %vm2405_vm4, %v2404_v16  ;;  %2174 = vmatpush3.bf16.msra.mxu0 %v2229_v52 }
0x222d   :  { %2175 = vmatprep.subr.bf16.mxu0 %v2404_v16 }
0x2230   :  { %2176 = vmatpush3.bf16.msra.mxu0 %v2230_v53 }
0x22fe   :  { %v1702_v0 = vpop.f32.mrb[48].mxu0 }
0x22ff   :  { %v1708_v2 = vadd.f32 %v1702_v0, %v2799_v38  ;;  %v2163_v11 = vpop.f32.mrb[49].mxu0  ;;  %v2031_v0 = vld [vmem:[%s2943_s10] ss:$0 sm:$0xff] }
0x2300   :  { %v1705_v13 = vpop.f32.mrb[50].mxu0 }
0x2301   :  { %2377 = vtanh.f32 %v1708_v2  ;;  %v2164_v14 = vpop.f32.mrb[51].mxu0  ;;  %v2022_v23 = vmul.f32 -1.442695, %v1708_v2 }
0x2303   :  { %2379 = vpow2.f32 %v2022_v23 }
0x230b   :  { %v2378_v24 = vpop.eup %2377 }
0x230c   :  { %1718 = vrot.lane.b32.xlu1 %v2378_v24, %s2406_s5 }
0x230d   :  { %v2380_v26 = vpop.eup %2379 }
0x230e   :  { %v1712_v28 = vadd.f32 1.0, %v2380_v26 }
0x2310   :  { %2381 = vrcp.f32 %v1712_v28 }
0x231a   :  { %v2382_v27 = vpop.eup %2381 }
0x231b   :  { %v1716_v33 = vmul.f32 %v2382_v27, %v1653_v10 }
0x237e   :  { %v1719_v31 = vpop.permute.xlu1 %1718 }
0x237f   :  { %v1721_v32 = vmul.f32 %v2382_v27, %v1719_v31 }
0x2381   :  { %1723 = vrot.lane.b32.xlu0 %v1721_v32, %s2406_s5 }
0x23f3   :  { %v1724_v7 = vpop.permute.xlu0 %1723 }
0x23f4   :  { %v1726_v38 = vadd.f32 %v1724_v7, %v1716_v33 }
0x23f6   :  { %2383 = vtanh.f32 %v1726_v38 }
0x23f7   :  { %2385 = vtanh.f32 %v1237_v35 }
0x23f8   :  { %2387 = vpow2.f32 %v2008_v46 }
0x2400   :  { %v2384_v9 = vpop.eup %2383 }
0x2401   :  { %1729 = vrot.lane.b32.xlu1 %v2384_v9, %s2406_s5  ;;  %v2386_v40 = vpop.eup %2385 }
0x2402   :  { %v2388_v41 = vpop.eup %2387 }
0x2403   :  { %v1246_v47 = vadd.f32 1.0, %v2388_v41 }
0x2405   :  { %2389 = vrcp.f32 %v1246_v47 }
0x240f   :  { %v2390_v49 = vpop.eup %2389 }
0x2473   :  { %v1730_v36 = vpop.permute.xlu1 %1729 }
0x2474   :  { %v1732_v37 = vmul.f32 %v2382_v27, %v1730_v36 }
0x2476   :  { %v1734_v39 = vpack.c.bf16 %v1732_v37, %v1732_v37 }
0x2478   :  { %1736 = vrot.lane.b32.xlu0 %v1734_v39, %s2402_s18 }
0x247c   :  { %1257 = vrot.lane.b32.xlu0 %v2386_v40, %s2406_s5 }
0x24ea   :  { %v1737_v50 = vpop.permute.xlu0 %1736 }
0x24eb   :  { %2170 = vmatmul.mubr.msk.bf16.vlgmr.msra.gmra.mrb[32].mxu1 %vm228_vm2, %v1737_v50 }
0x24ec   :  { %2185 = vmatprep.mubr.msk.bf16.mxu1 %vm2405_vm4, %v2404_v16  ;;  %2182 = vmatpush3.bf16.msra.mxu1 %v2231_v25 }
0x24ed   :  { %2183 = vmatprep.subr.bf16.mxu1 %v2404_v16 }
0x24ee   :  { %v1258_v42 = vpop.permute.xlu0 %1257 }
0x24ef   :  { %v1262_v51 = vmul.f32 %v2390_v49, %v1258_v42 }
0x24f0   :  { %2184 = vmatpush3.bf16.msra.mxu1 %v2232_v30 }
0x24f1   :  { %2391 = vtanh.f32 %v1262_v51 }
0x24fb   :  { %v2392_v43 = vpop.eup %2391 }
0x24fc   :  { %1269 = vrot.lane.b32.xlu0 %v2392_v43, %s2402_s18 }
0x256e   :  { %v1270_v55 = vpop.permute.xlu0 %1269 }
0x256f   :  { %v1274_v56 = vmul.f32 %v2390_v49, %v1270_v55 }
0x2571   :  { %v1811_v57 = vpack.c.bf16 %v1274_v56, %v1274_v56 }
0x2573   :  { %1817 = vrot.lane.b32.xlu0 %v1811_v57, %s2402_s18 }
0x25be   :  { %v1775_v58 = vpop.f32.mrb[32].mxu1 }
0x25bf   :  { %v1781_v45 = vadd.f32 %v1775_v58, %v2803_v8  ;;  %v2171_v59 = vpop.f32.mrb[33].mxu1 }
0x25c0   :  { %v1778_v60 = vpop.f32.mrb[34].mxu1 }
0x25c1   :  { %2393 = vtanh.f32 %v1781_v45  ;;  %v2172_v62 = vpop.f32.mrb[35].mxu1  ;;  %v2024_v3 = vmul.f32 -1.442695, %v1781_v45 }
0x25c3   :  { %2395 = vpow2.f32 %v2024_v3 }
0x25cb   :  { %v2394_v63 = vpop.eup %2393 }
0x25cc   :  { %1791 = vrot.lane.b32.xlu1 %v2394_v63, %s2406_s5 }
0x25cd   :  { %v2396_v1 = vpop.eup %2395 }
0x25ce   :  { %v1785_v4 = vadd.f32 1.0, %v2396_v1 }
0x25d0   :  { %2397 = vrcp.f32 %v1785_v4 }
0x25da   :  { %v2398_v17 = vpop.eup %2397 }
0x25db   :  { %v1789_v8 = vmul.f32 %v2398_v17, %v1726_v38 }
0x25e5   :  { %v1818_v15 = vpop.permute.xlu0 %1817 }
0x25e6   :  { %2178 = vmatmul.mubr.msk.bf16.vlgmr.msra.gmra.mrb[52].mxu0 %vm228_vm2, %v1818_v15 }
0x263e   :  { %v1792_v5 = vpop.permute.xlu1 %1791 }
0x263f   :  { %v1794_v19 = vmul.f32 %v2398_v17, %v1792_v5 }
0x2641   :  { %1796 = vrot.lane.b32.xlu1 %v1794_v19, %s2406_s5 }
0x26b3   :  { %v1797_v29 = vpop.permute.xlu1 %1796 }
0x26b4   :  { %v1799_v20 = vadd.f32 %v1797_v29, %v1789_v8 }
0x26b6   :  { %2399 = vtanh.f32 %v1799_v20 }
0x26b9   :  { %v1868_v48 = vpop.f32.mrb[52].mxu0 }
0x26ba   :  { %v2179_v21 = vpop.f32.mrb[53].mxu0 }
0x26bb   :  { %v1871_v22 = vpop.f32.mrb[54].mxu0 }
0x26bc   :  { %v2180_v18 = vpop.f32.mrb[55].mxu0 }
0x26c0   :  { %v2400_v10 = vpop.eup %2399 }
0x26c1   :  { %1802 = vrot.lane.b32.xlu1 %v2400_v10, %s2406_s5 }
0x2733   :  { %v1803_v12 = vpop.permute.xlu1 %1802 }
0x2734   :  { %v1805_v44 = vmul.f32 %v2398_v17, %v1803_v12 }
0x2736   :  { %v1806_v6 = vpack.c.bf16 %v1805_v44, %v1805_v44 }
0x2738   :  { %1875 = vrot.lane.b32.xlu1 %v1806_v6, %s2402_s18 }
0x27aa   :  { %v1876_v54 = vpop.permute.xlu1 %1875 }
0x27ab   :  { %2186 = vmatmul.mubr.msk.bf16.vlgmr.msra.gmra.mrb[36].mxu1 %vm228_vm2, %v1876_v54 }
0x287e   :  { %v1926_v61 = vpop.f32.mrb[36].mxu1 }
0x287f   :  { %v1927_v2 = vadd.f32 %v1926_v61, %v1868_v48  ;;  %v2187_v16 = vpop.f32.mrb[37].mxu1 }
0x2880   :  { %v1929_v11 = vpop.f32.mrb[38].mxu1 }
0x2881   :  { %v1939_v13 = vadd.f32 %v2031_v0, %v1927_v2  ;;  %v2188_v14 = vpop.f32.mrb[39].mxu1 }
0x2883   :  { %1941 = vst.msk [vmem:[%s2944_s11] sm:$0xff] %vm1940_vm5, %v1939_v13 }

</bundles_post_ra>
